<compile_context>
chip_gen: v5e
topology: v5e:2x2
jax: 0.10.0
libtpu: 0.0.40
codegen_flags: <defaults>
</compile_context>

<pallas_src>
import functools

import jax
import jax.numpy as jnp
from jax import lax
from jax.experimental import pallas as pl
from jax.experimental.pallas import tpu as pltpu

EPS = 1e-5          # InstanceNorm2d default eps
LRELU_SLOPE = 0.01  # nn.LeakyReLU default negative_slope


def _cbr_kernel(x_ref, w_ref, o_ref, *, K, stride, Ho, Wo, C_out):
    # x_ref: (1, Hp, Wp, C_in)   spatially padded NHWC input, one batch element
    # w_ref: (K*K, C_in, Cp)     conv weights, C_out zero-padded to Cp (x128)
    # o_ref: (1, C_out, Ho*Wo)   output, HW on the lane axis (lane-dense store)
    HW = Ho * Wo
    Cp = w_ref.shape[2]

    x = x_ref[0]                                   # (Hp, Wp, C_in)

    # Convolution as K*K accumulated matmuls over in-kernel shifted views
    # (fused im2col -- nothing is materialized in HBM).
    acc = jnp.zeros((HW, Cp), dtype=jnp.float32)
    for i in range(K):
        for j in range(K):
            if stride == 1:
                xs = x[i:i + Ho, j:j + Wo, :]      # (Ho, Wo, C_in)
            else:
                span_h = (Ho - 1) * stride + 1
                span_w = (Wo - 1) * stride + 1
                xs = lax.slice(x, (i, j, 0),
                               (i + span_h, j + span_w, x.shape[2]),
                               (stride, stride, 1))
            xs = xs.reshape(HW, xs.shape[-1])      # (HW, C_in)
            w_ij = w_ref[i * K + j]                # (C_in, Cp)
            acc = acc + jnp.dot(xs, w_ij, preferred_element_type=jnp.float32)

    # InstanceNorm2d (affine=False, biased variance) over spatial, per channel.
    mean = jnp.mean(acc, axis=0, keepdims=True)    # (1, Cp)
    ctr = acc - mean
    var = jnp.mean(ctr * ctr, axis=0, keepdims=True)
    y = ctr * lax.rsqrt(var + EPS)

    # LeakyReLU.
    y = jnp.where(y >= 0, y, LRELU_SLOPE * y)

    # (HW, Cp) -> (Cp, HW): lane-dense store with HW on the lane axis; slice
    # away the padded channels (they are exactly zero).
    yt = y.T                                       # (Cp, HW)
    o_ref[0] = yt[:C_out, :].astype(o_ref.dtype)


@functools.partial(jax.jit, static_argnames=("kernel", "stride", "pad"))
def cbr_forward(x_nchw, weight, bias, *, kernel, stride, pad):
    """CBR forward (default flags: up=False, norm='in', activ='lrelu', sn=False).

    x_nchw : (N, C_in, H, W)      (PyTorch NCHW convention)
    weight : (C_out, C_in, K, K)  (PyTorch conv weight layout)
    bias   : (C_out,)             -- mathematically cancelled by InstanceNorm
                                     (affine=False), so it is not used.
    returns: (N, C_out, H_out, W_out)
    """
    del bias  # cancels exactly under InstanceNorm's per-channel mean subtraction

    N, C_in, H, W = x_nchw.shape
    C_out = weight.shape[0]
    Ho = (H + 2 * pad - kernel) // stride + 1
    Wo = (W + 2 * pad - kernel) // stride + 1
    HW = Ho * Wo
    Hp, Wp = H + 2 * pad, W + 2 * pad

    # NCHW -> NHWC, spatial zero-pad once (no K*K im2col blow-up).
    x_nhwc = jnp.transpose(x_nchw, (0, 2, 3, 1))
    x_pad = jnp.pad(x_nhwc, ((0, 0), (pad, pad), (pad, pad), (0, 0)))

    # (C_out, C_in, K, K) -> (K*K, C_in, C_out), C_out zero-padded to 128 lanes.
    Cp = ((C_out + 127) // 128) * 128
    w_r = jnp.transpose(weight, (2, 3, 1, 0)).reshape(kernel * kernel, C_in, C_out)
    w_r = jnp.pad(w_r, ((0, 0), (0, 0), (0, Cp - C_out)))

    kern = functools.partial(_cbr_kernel, K=kernel, stride=stride,
                             Ho=Ho, Wo=Wo, C_out=C_out)

    out = pl.pallas_call(
        kern,
        out_shape=jax.ShapeDtypeStruct((N, C_out, HW), x_nchw.dtype),
        grid_spec=pltpu.PrefetchScalarGridSpec(
            num_scalar_prefetch=0,
            grid=(N,),
            in_specs=[
                pl.BlockSpec((1, Hp, Wp, C_in), lambda n: (n, 0, 0, 0)),
                pl.BlockSpec((kernel * kernel, C_in, Cp), lambda n: (0, 0, 0)),
            ],
            out_specs=pl.BlockSpec((1, C_out, HW), lambda n: (n, 0, 0)),
        ),
        compiler_params=pltpu.CompilerParams(
            dimension_semantics=("parallel",),
            vmem_limit_bytes=32 * 1024 * 1024,
        ),
    )(x_pad, w_r)

    # (N, C_out, HW) -> (N, C_out, H_out, W_out): pure reshape, no transpose.
    return out.reshape(N, C_out, Ho, Wo)


def _reference(x_nchw, weight, bias, *, kernel, stride, pad):
    """Plain-JAX reference (conv(+bias) -> instance norm -> leaky relu)."""
    y = lax.conv_general_dilated(
        x_nchw, weight,
        window_strides=(stride, stride),
        padding=[(pad, pad), (pad, pad)],
        dimension_numbers=("NCHW", "OIHW", "NCHW"),
    ) + bias.reshape(1, -1, 1, 1)
    mean = jnp.mean(y, axis=(2, 3), keepdims=True)
    var = jnp.mean((y - mean) ** 2, axis=(2, 3), keepdims=True)
    y = (y - mean) * lax.rsqrt(var + EPS)
    return jnp.where(y >= 0, y, LRELU_SLOPE * y)


if __name__ == "__main__":
    # Small shapes consistent with CBR(in_ch=4, out_ch=8, kernel=3, stride=1, pad=1)
    N, C_in, H, W = 2, 4, 16, 16
    C_out, K, STRIDE, PAD = 8, 3, 1, 1

    key = jax.random.PRNGKey(0)
    kx, kw, kb = jax.random.split(key, 3)
    x = jax.random.normal(kx, (N, C_in, H, W), dtype=jnp.float32)
    weight = jax.random.normal(kw, (C_out, C_in, K, K), dtype=jnp.float32) * 0.1
    bias = jax.random.normal(kb, (C_out,), dtype=jnp.float32) * 0.1

    out = cbr_forward(x, weight, bias, kernel=K, stride=STRIDE, pad=PAD)
    out = jax.block_until_ready(out)

    ref = _reference(x, weight, bias, kernel=K, stride=STRIDE, pad=PAD)
    assert out.shape == (N, C_out, H, W)
    assert jnp.allclose(out, ref, rtol=1e-4, atol=1e-4), "mismatch vs reference"

    print("KERNEL_OK")
</pallas_src>

<mosaic_0001>
module attributes {stable_mosaic.version = 11 : i64} {
  func.func @_cbr_kernel(%arg0: i32, %arg1: memref<1x18x18x4xf32, #tpu.memory_space<vmem>>, %arg2: memref<9x4x128xf32, #tpu.memory_space<vmem>>, %arg3: memref<1x8x256xf32, #tpu.memory_space<vmem>>) attributes {dimension_semantics = [#tpu.dimension_semantics<parallel>], iteration_bounds = array<i64: 2>, scalar_prefetch = 0 : i64, scratch_operands = 0 : i64, tpu.core_type = #tpu.core_type<tc>, window_params = [{transform_indices = @transform_0, window_bounds = array<i64: 1, 18, 18, 4>}, {pipeline_mode = #tpu.pipeline_mode<synchronous>, transform_indices = @transform_1, window_bounds = array<i64: 9, 4, 128>}, {transform_indices = @transform_2, window_bounds = array<i64: 1, 8, 256>}]} {
    %c0 = arith.constant 0 : index
    %c0_0 = arith.constant 0 : index
    %c0_1 = arith.constant 0 : index
    %c0_2 = arith.constant 0 : index
    %0 = vector.load %arg1[%c0, %c0_0, %c0_1, %c0_2] : memref<1x18x18x4xf32, #tpu.memory_space<vmem>>, vector<1x18x18x4xf32>
    %1 = vector.shape_cast %0 : vector<1x18x18x4xf32> to vector<18x18x4xf32>
    %cst = arith.constant 0.000000e+00 : f32
    %2 = vector.broadcast %cst : f32 to vector<256x128xf32>
    %3 = vector.extract_strided_slice %1 {offsets = [0, 0, 0], sizes = [16, 16, 4], strides = [1, 1, 1]} : vector<18x18x4xf32> to vector<16x16x4xf32>
    %4 = vector.shape_cast %3 : vector<16x16x4xf32> to vector<256x4xf32>
    %c0_3 = arith.constant 0 : index
    %c0_4 = arith.constant 0 : index
    %c0_5 = arith.constant 0 : index
    %5 = vector.load %arg2[%c0_3, %c0_4, %c0_5] : memref<9x4x128xf32, #tpu.memory_space<vmem>>, vector<1x4x128xf32>
    %6 = vector.shape_cast %5 : vector<1x4x128xf32> to vector<4x128xf32>
    %cst_6 = arith.constant dense<0.000000e+00> : vector<256x128xf32>
    %7 = tpu.matmul %4, %6, %cst_6 {dimension_numbers = #tpu.dot_dimension_numbers<[1], [0], [0], [1], [0, 0, 1, 1], [], []>} : vector<256x4xf32>, vector<4x128xf32>, vector<256x128xf32> -> vector<256x128xf32>
    %8 = arith.addf %2, %7 : vector<256x128xf32>
    %9 = vector.extract_strided_slice %1 {offsets = [0, 1, 0], sizes = [16, 16, 4], strides = [1, 1, 1]} : vector<18x18x4xf32> to vector<16x16x4xf32>
    %10 = vector.shape_cast %9 : vector<16x16x4xf32> to vector<256x4xf32>
    %c1 = arith.constant 1 : index
    %c0_7 = arith.constant 0 : index
    %c0_8 = arith.constant 0 : index
    %11 = vector.load %arg2[%c1, %c0_7, %c0_8] : memref<9x4x128xf32, #tpu.memory_space<vmem>>, vector<1x4x128xf32>
    %12 = vector.shape_cast %11 : vector<1x4x128xf32> to vector<4x128xf32>
    %cst_9 = arith.constant dense<0.000000e+00> : vector<256x128xf32>
    %13 = tpu.matmul %10, %12, %cst_9 {dimension_numbers = #tpu.dot_dimension_numbers<[1], [0], [0], [1], [0, 0, 1, 1], [], []>} : vector<256x4xf32>, vector<4x128xf32>, vector<256x128xf32> -> vector<256x128xf32>
    %14 = arith.addf %8, %13 : vector<256x128xf32>
    %15 = vector.extract_strided_slice %1 {offsets = [0, 2, 0], sizes = [16, 16, 4], strides = [1, 1, 1]} : vector<18x18x4xf32> to vector<16x16x4xf32>
    %16 = vector.shape_cast %15 : vector<16x16x4xf32> to vector<256x4xf32>
    %c2 = arith.constant 2 : index
    %c0_10 = arith.constant 0 : index
    %c0_11 = arith.constant 0 : index
    %17 = vector.load %arg2[%c2, %c0_10, %c0_11] : memref<9x4x128xf32, #tpu.memory_space<vmem>>, vector<1x4x128xf32>
    %18 = vector.shape_cast %17 : vector<1x4x128xf32> to vector<4x128xf32>
    %cst_12 = arith.constant dense<0.000000e+00> : vector<256x128xf32>
    %19 = tpu.matmul %16, %18, %cst_12 {dimension_numbers = #tpu.dot_dimension_numbers<[1], [0], [0], [1], [0, 0, 1, 1], [], []>} : vector<256x4xf32>, vector<4x128xf32>, vector<256x128xf32> -> vector<256x128xf32>
    %20 = arith.addf %14, %19 : vector<256x128xf32>
    %21 = vector.extract_strided_slice %1 {offsets = [1, 0, 0], sizes = [16, 16, 4], strides = [1, 1, 1]} : vector<18x18x4xf32> to vector<16x16x4xf32>
    %22 = vector.shape_cast %21 : vector<16x16x4xf32> to vector<256x4xf32>
    %c3 = arith.constant 3 : index
    %c0_13 = arith.constant 0 : index
    %c0_14 = arith.constant 0 : index
    %23 = vector.load %arg2[%c3, %c0_13, %c0_14] : memref<9x4x128xf32, #tpu.memory_space<vmem>>, vector<1x4x128xf32>
    %24 = vector.shape_cast %23 : vector<1x4x128xf32> to vector<4x128xf32>
    %cst_15 = arith.constant dense<0.000000e+00> : vector<256x128xf32>
    %25 = tpu.matmul %22, %24, %cst_15 {dimension_numbers = #tpu.dot_dimension_numbers<[1], [0], [0], [1], [0, 0, 1, 1], [], []>} : vector<256x4xf32>, vector<4x128xf32>, vector<256x128xf32> -> vector<256x128xf32>
    %26 = arith.addf %20, %25 : vector<256x128xf32>
    %27 = vector.extract_strided_slice %1 {offsets = [1, 1, 0], sizes = [16, 16, 4], strides = [1, 1, 1]} : vector<18x18x4xf32> to vector<16x16x4xf32>
    %28 = vector.shape_cast %27 : vector<16x16x4xf32> to vector<256x4xf32>
    %c4 = arith.constant 4 : index
    %c0_16 = arith.constant 0 : index
    %c0_17 = arith.constant 0 : index
    %29 = vector.load %arg2[%c4, %c0_16, %c0_17] : memref<9x4x128xf32, #tpu.memory_space<vmem>>, vector<1x4x128xf32>
    %30 = vector.shape_cast %29 : vector<1x4x128xf32> to vector<4x128xf32>
    %cst_18 = arith.constant dense<0.000000e+00> : vector<256x128xf32>
    %31 = tpu.matmul %28, %30, %cst_18 {dimension_numbers = #tpu.dot_dimension_numbers<[1], [0], [0], [1], [0, 0, 1, 1], [], []>} : vector<256x4xf32>, vector<4x128xf32>, vector<256x128xf32> -> vector<256x128xf32>
    %32 = arith.addf %26, %31 : vector<256x128xf32>
    %33 = vector.extract_strided_slice %1 {offsets = [1, 2, 0], sizes = [16, 16, 4], strides = [1, 1, 1]} : vector<18x18x4xf32> to vector<16x16x4xf32>
    %34 = vector.shape_cast %33 : vector<16x16x4xf32> to vector<256x4xf32>
    %c5 = arith.constant 5 : index
    %c0_19 = arith.constant 0 : index
    %c0_20 = arith.constant 0 : index
    %35 = vector.load %arg2[%c5, %c0_19, %c0_20] : memref<9x4x128xf32, #tpu.memory_space<vmem>>, vector<1x4x128xf32>
    %36 = vector.shape_cast %35 : vector<1x4x128xf32> to vector<4x128xf32>
    %cst_21 = arith.constant dense<0.000000e+00> : vector<256x128xf32>
    %37 = tpu.matmul %34, %36, %cst_21 {dimension_numbers = #tpu.dot_dimension_numbers<[1], [0], [0], [1], [0, 0, 1, 1], [], []>} : vector<256x4xf32>, vector<4x128xf32>, vector<256x128xf32> -> vector<256x128xf32>
    %38 = arith.addf %32, %37 : vector<256x128xf32>
    %39 = vector.extract_strided_slice %1 {offsets = [2, 0, 0], sizes = [16, 16, 4], strides = [1, 1, 1]} : vector<18x18x4xf32> to vector<16x16x4xf32>
    %40 = vector.shape_cast %39 : vector<16x16x4xf32> to vector<256x4xf32>
    %c6 = arith.constant 6 : index
    %c0_22 = arith.constant 0 : index
    %c0_23 = arith.constant 0 : index
    %41 = vector.load %arg2[%c6, %c0_22, %c0_23] : memref<9x4x128xf32, #tpu.memory_space<vmem>>, vector<1x4x128xf32>
    %42 = vector.shape_cast %41 : vector<1x4x128xf32> to vector<4x128xf32>
    %cst_24 = arith.constant dense<0.000000e+00> : vector<256x128xf32>
    %43 = tpu.matmul %40, %42, %cst_24 {dimension_numbers = #tpu.dot_dimension_numbers<[1], [0], [0], [1], [0, 0, 1, 1], [], []>} : vector<256x4xf32>, vector<4x128xf32>, vector<256x128xf32> -> vector<256x128xf32>
    %44 = arith.addf %38, %43 : vector<256x128xf32>
    %45 = vector.extract_strided_slice %1 {offsets = [2, 1, 0], sizes = [16, 16, 4], strides = [1, 1, 1]} : vector<18x18x4xf32> to vector<16x16x4xf32>
    %46 = vector.shape_cast %45 : vector<16x16x4xf32> to vector<256x4xf32>
    %c7 = arith.constant 7 : index
    %c0_25 = arith.constant 0 : index
    %c0_26 = arith.constant 0 : index
    %47 = vector.load %arg2[%c7, %c0_25, %c0_26] : memref<9x4x128xf32, #tpu.memory_space<vmem>>, vector<1x4x128xf32>
    %48 = vector.shape_cast %47 : vector<1x4x128xf32> to vector<4x128xf32>
    %cst_27 = arith.constant dense<0.000000e+00> : vector<256x128xf32>
    %49 = tpu.matmul %46, %48, %cst_27 {dimension_numbers = #tpu.dot_dimension_numbers<[1], [0], [0], [1], [0, 0, 1, 1], [], []>} : vector<256x4xf32>, vector<4x128xf32>, vector<256x128xf32> -> vector<256x128xf32>
    %50 = arith.addf %44, %49 : vector<256x128xf32>
    %51 = vector.extract_strided_slice %1 {offsets = [2, 2, 0], sizes = [16, 16, 4], strides = [1, 1, 1]} : vector<18x18x4xf32> to vector<16x16x4xf32>
    %52 = vector.shape_cast %51 : vector<16x16x4xf32> to vector<256x4xf32>
    %c8 = arith.constant 8 : index
    %c0_28 = arith.constant 0 : index
    %c0_29 = arith.constant 0 : index
    %53 = vector.load %arg2[%c8, %c0_28, %c0_29] : memref<9x4x128xf32, #tpu.memory_space<vmem>>, vector<1x4x128xf32>
    %54 = vector.shape_cast %53 : vector<1x4x128xf32> to vector<4x128xf32>
    %cst_30 = arith.constant dense<0.000000e+00> : vector<256x128xf32>
    %55 = tpu.matmul %52, %54, %cst_30 {dimension_numbers = #tpu.dot_dimension_numbers<[1], [0], [0], [1], [0, 0, 1, 1], [], []>} : vector<256x4xf32>, vector<4x128xf32>, vector<256x128xf32> -> vector<256x128xf32>
    %56 = arith.addf %50, %55 : vector<256x128xf32>
    %cst_31 = arith.constant dense<0.000000e+00> : vector<128xf32>
    %57 = vector.multi_reduction <add>, %56, %cst_31 [0] : vector<256x128xf32> to vector<128xf32>
    %58 = vector.shape_cast %57 : vector<128xf32> to vector<1x128xf32>
    %cst_32 = arith.constant 2.560000e+02 : f32
    %59 = vector.broadcast %cst_32 : f32 to vector<1x128xf32>
    %60 = arith.divf %58, %59 : vector<1x128xf32>
    %61 = vector.broadcast %60 : vector<1x128xf32> to vector<256x128xf32>
    %62 = arith.subf %56, %61 : vector<256x128xf32>
    %63 = arith.mulf %62, %62 : vector<256x128xf32>
    %cst_33 = arith.constant dense<0.000000e+00> : vector<128xf32>
    %64 = vector.multi_reduction <add>, %63, %cst_33 [0] : vector<256x128xf32> to vector<128xf32>
    %65 = vector.shape_cast %64 : vector<128xf32> to vector<1x128xf32>
    %cst_34 = arith.constant 2.560000e+02 : f32
    %66 = vector.broadcast %cst_34 : f32 to vector<1x128xf32>
    %67 = arith.divf %65, %66 : vector<1x128xf32>
    %cst_35 = arith.constant 9.99999974E-6 : f32
    %68 = vector.broadcast %cst_35 : f32 to vector<1x128xf32>
    %69 = arith.addf %67, %68 : vector<1x128xf32>
    %70 = math.rsqrt %69 : vector<1x128xf32>
    %71 = vector.broadcast %70 : vector<1x128xf32> to vector<256x128xf32>
    %72 = arith.mulf %62, %71 : vector<256x128xf32>
    %cst_36 = arith.constant 0.000000e+00 : f32
    %73 = vector.broadcast %cst_36 : f32 to vector<256x128xf32>
    %74 = arith.cmpf oge, %72, %73 : vector<256x128xf32>
    %cst_37 = arith.constant 0.00999999977 : f32
    %75 = vector.broadcast %cst_37 : f32 to vector<256x128xf32>
    %76 = arith.mulf %75, %72 : vector<256x128xf32>
    %77 = arith.select %74, %72, %76 : vector<256x128xi1>, vector<256x128xf32>
    %78 = tpu.transpose %77, [1, 0] : vector<256x128xf32> -> vector<128x256xf32>
    %79 = vector.extract_strided_slice %78 {offsets = [0, 0], sizes = [8, 256], strides = [1, 1]} : vector<128x256xf32> to vector<8x256xf32>
    %c0_38 = arith.constant 0 : index
    %c0_39 = arith.constant 0 : index
    %c0_40 = arith.constant 0 : index
    %80 = vector.load %arg3[%c0_38, %c0_39, %c0_40] : memref<1x8x256xf32, #tpu.memory_space<vmem>>, vector<1x8x256xf32>
    %81 = vector.shape_cast %80 : vector<1x8x256xf32> to vector<8x256xf32>
    %82 = vector.shape_cast %79 : vector<8x256xf32> to vector<1x8x256xf32>
    tpu.vector_store %arg3[%c0_38, %c0_39, %c0_40], %82 {strides = array<i32>} : memref<1x8x256xf32, #tpu.memory_space<vmem>>, vector<1x8x256xf32>,
    return
  }
  func.func @transform_0(%arg0: i32) -> (i32, i32, i32, i32) {
    %c0_i32 = arith.constant 0 : i32
    %c0_i32_0 = arith.constant 0 : i32
    %c0_i32_1 = arith.constant 0 : i32
    %c0_i32_2 = arith.constant 0 : i32
    return %arg0, %c0_i32, %c0_i32_0, %c0_i32_1 : i32, i32, i32, i32
  }
  func.func @transform_1(%arg0: i32) -> (i32, i32, i32) {
    %c0_i32 = arith.constant 0 : i32
    %c0_i32_0 = arith.constant 0 : i32
    %c0_i32_1 = arith.constant 0 : i32
    %c0_i32_2 = arith.constant 0 : i32
    return %c0_i32, %c0_i32_0, %c0_i32_1 : i32, i32, i32
  }
  func.func @transform_2(%arg0: i32) -> (i32, i32, i32) {
    %c0_i32 = arith.constant 0 : i32
    %c0_i32_0 = arith.constant 0 : i32
    %c0_i32_1 = arith.constant 0 : i32
    return %arg0, %c0_i32, %c0_i32_0 : i32, i32, i32
  }
}

</mosaic_0001>

<bundles_post_ra>
// kernel: cbr_forward.1
= control target key start
LH: loop header
LB: loop body
LE: loop exit
PB: predicated region body
PF: predicated region fallthrough
CT: control target
= control target key end

     0   :  { %s2725_s9 = smov 0   ;;  %s4331_s0 = inlined_call_operand.vmem [shape: f32[2,18,18,4], index: 0, kind: input, shape index: {}]   ;;  %s4332_s1 = inlined_call_operand.vmem [shape: f32[9,4,128], index: 1, kind: input, shape index: {}]   ;;  %s4333_s2 = inlined_call_operand.vmem [shape: f32[2,8,256], index: 2, kind: output, shape index: {}]  }
   0x1 LB: > { %s2344_s10 = sadd.s32 4294967295, %s2707_s9   ;;  %p2348_p0 = scmp.ge.s32.totalorder %s2707_s9, 1  ;;  %s2707_s9 = sphi %s2725_s9, %s12_s9  }
   0x2   : > { %p112_p1 = scmp.lt.s32.totalorder %s2707_s9, 3 }
   0x4   : > { %p113_p2 = pnand %p2348_p0, %p112_p1 }
   0x6   : > { %116 = sbr.rel (%p113_p2) target bundleno = 1017 (0x3f9), region = 28 }
   0xb   : > { %v2352_v0 = vld [vmem:[%s4332_s1 + $0x4] sm:$0xf]  ;;  %vm395_vm0 = vcmask 1043456   ;;  %p134_p3 = scmp.lt.s32.totalorder %s2344_s10, 1  ;;  %v2419_v1 = vld [vmem:[%s4332_s1 + $0x8] sm:$0xf] }
   0xc   : > { %2660 = vmatpush.msk.msra.mxu1 %vm395_vm0, %v2352_v0  ;;  %2661 = vmatpush.msk.msra.mxu2 %vm395_vm0, %v2352_v0  ;;  %v2453_v2 = vld [vmem:[%s4332_s1 + $0xc] sm:$0xf]  ;;  %v198_v3 = vld [vmem:[%s4332_s1] sm:$0xf]  ;;  %v2487_v4 = vld [vmem:[%s4332_s1 + $0x10] sm:$0xf] }
   0xd   : > { %s4551_s10 = smov (!%p134_p3, %s2344_s10), 1  ;;  %2662 = vmatpush.msk.msra.mxu3 %vm395_vm0, %v2352_v0  ;;  %2353 = vmatpush.msk.msra.mxu0 %vm395_vm0, %v2352_v0  ;;  %vm247_vm1 = vcmask 1046528   ;;  %vm330_vm2 = vcmask 31744   ;;  %vm692_vm3 = vcmask 1045504  }
   0xe   : > { %2420 = vmatpush.msk.msrb.mxu2 %vm395_vm0, %v2419_v1  ;;  %2386 = vmatpush.msk.msrb.mxu1 %vm395_vm0, %v198_v3  ;;  %s2663_s21 = smul.u32 432, %s4551_s10  ;;  %s2659_s5 = sshll.u32 %s4551_s10, 4 }
   0xf   : > { %2454 = vmatpush.msk.msrb.mxu3 %vm395_vm0, %v2453_v2  ;;  %2488 = vmatpush.msk.msrb.mxu0 %vm395_vm0, %v2487_v4  ;;  %s143_s8 = scalar_lea.vmem %s4333_s2, %s2659_s5 }
  0x10   : > { %s2762_s24 = scalar_lea.vmem %s4331_s0, %s2663_s21 }
  0x11   : > { %v2765_v5 = vld [vmem:[%s2762_s24 + $0x60] sm:$0xff]  ;;  %v2768_v6 = vld [vmem:[%s2762_s24 + $0x68] sm:$0xff]  ;;  %v2789_v17 = vld [vmem:[%s2762_s24 + $0x70] sm:$0x3] }
  0x12   : > { %v2771_v7 = vld [vmem:[%s2762_s24 + $0xc0] sm:$0xff]  ;;  %v268_v8 = vrot.slane %v2765_v5, 1  ;;  %v269_v9 = vrot.slane %v2768_v6, 1  ;;  %v2776_v10 = vld [vmem:[%s2762_s24 + $0xc8] sm:$0xff]  ;;  %v2798_v20 = vld [vmem:[%s2762_s24 + $0xd0] sm:$0x3] }
  0x13   : > { %v288_v11 = vrot.slane %v2771_v7, 1  ;;  %v2780_v12 = vld [vmem:[%s2762_s24 + $0x120] sm:$0xff]  ;;  %v2783_v13 = vld [vmem:[%s2762_s24 + $0x128] sm:$0xff]  ;;  %v289_v14 = vrot.slane %v2776_v10, 1  ;;  %v2814_v26 = vld [vmem:[%s2762_s24 + $0x130] sm:$0x3] }
  0x14   : > { %4410 = vst [vmem:[#allocation2_spill] sm:$0xff] %v2780_v12  ;;  %v308_v15 = vrot.slane %v2780_v12, 1  ;;  %v309_v16 = vrot.slane %v2783_v13, 1  ;;  %v2792_v18 = vld [vmem:[%s2762_s24] sm:$0xff]  ;;  %v2795_v19 = vsel %vm247_vm1, %v268_v8, %v269_v9  ;;  %v2801_v21 = vld [vmem:[%s2762_s24 + $0x8] sm:$0xff]  ;;  %v271_v27 = vrot.slane %v2789_v17, 1 }
  0x15   : > { %4411 = vst [vmem:[#allocation3_spill] sm:$0xff] %v2783_v13  ;;  %v248_v22 = vrot.slane %v2792_v18, 1  ;;  %2362 = vmatmul.msk.f32.vlgmr.msra.gmra.mxu1 %vm330_vm2, %v2795_v19  ;;  %v2807_v23 = vsel %vm247_vm1, %v288_v11, %v289_v14  ;;  %v249_v25 = vrot.slane %v2801_v21, 1  ;;  %v2822_v28 = vld [vmem:[%s2762_s24 + $0x10] sm:$0x3]  ;;  %v291_v29 = vrot.slane %v2798_v20, 1 }
  0x16   : > { %4412 = vst [vmem:[#allocation4_spill] sm:$0xff] %v2807_v23  ;;  %v2810_v24 = vsel %vm247_vm1, %v308_v15, %v309_v16  ;;  %2370 = vmatmul.msk.f32.vlgmr.msra.gmra.mxu2 %vm330_vm2, %v2807_v23  ;;  %v311_v31 = vrot.slane %v2814_v26, 1  ;;  %v251_v32 = vrot.slane %v2822_v28, 1  ;;  %v2830_v33 = vsel %vm247_vm1, %v269_v9, %v271_v27  ;;  %v2839_v36 = vld [vmem:[%s2762_s24 + $0x78] sm:$0xff]  ;;  %v2842_v37 = vld [vmem:[%s2762_s24 + $0x80] sm:$0xff]  ;;  %v2924_v4 = vld [vmem:[%s2762_s24 + $0x90] sm:$0xff] }
  0x17   : > { %4413 = vst [vmem:[#allocation5_spill] sm:$0xff] %v2810_v24  ;;  %2378 = vmatmul.msk.f32.vlgmr.msra.gmra.mxu3 %vm330_vm2, %v2810_v24  ;;  %v250_v30 = vsel %vm247_vm1, %v248_v22, %v249_v25  ;;  %v2833_v34 = vsel %vm247_vm1, %v289_v14, %v291_v29  ;;  %v2845_v38 = vld [vmem:[%s2762_s24 + $0xd8] sm:$0xff]  ;;  %v2848_v39 = vld [vmem:[%s2762_s24 + $0xe0] sm:$0xff]  ;;  %v273_v43 = vrot.slane %v2839_v36, 1  ;;  %v274_v44 = vrot.slane %v2842_v37, 1  ;;  %v2930_v9 = vld [vmem:[%s2762_s24 + $0xf0] sm:$0xff] }
  0x18   : > { %4414 = vst [vmem:[#allocation6_spill] sm:$0xff] %v2814_v26  ;;  %2354 = vmatmul.msk.f32.vlgmr.msra.gmra.mxu0 %vm330_vm2, %v250_v30  ;;  %v2836_v35 = vsel %vm247_vm1, %v309_v16, %v311_v31  ;;  %v2851_v40 = vld [vmem:[%s2762_s24 + $0x138] sm:$0xff]  ;;  %v2854_v41 = vld [vmem:[%s2762_s24 + $0x140] sm:$0xff]  ;;  %v252_v42 = vsel %vm247_vm1, %v249_v25, %v251_v32  ;;  %v293_v47 = vrot.slane %v2845_v38, 1  ;;  %v294_v48 = vrot.slane %v2848_v39, 1  ;;  %v2936_v14 = vld [vmem:[%s2762_s24 + $0x150] sm:$0xff] }
  0x19   : > { %4415 = vst [vmem:[#allocation7_spill] sm:$0xff] %v2830_v33  ;;  %v2866_v45 = vld [vmem:[%s2762_s24 + $0x18] sm:$0xff]  ;;  %v2869_v46 = vld [vmem:[%s2762_s24 + $0x20] sm:$0xff]  ;;  %v313_v49 = vrot.slane %v2851_v40, 1  ;;  %v314_v50 = vrot.slane %v2854_v41, 1  ;;  %v2879_v53 = vsel %vm247_vm1, %v273_v43, %v274_v44  ;;  %v278_v22 = vrot.slane %v2924_v4, 1 }
  0x1a   : > { %4416 = vst [vmem:[#allocation8_spill] sm:$0xff] %v2833_v34  ;;  %v253_v51 = vrot.slane %v2866_v45, 1  ;;  %v254_v52 = vrot.slane %v2869_v46, 1  ;;  %v2882_v54 = vsel %vm247_vm1, %v293_v47, %v294_v48  ;;  %v2888_v56 = vld [vmem:[%s2762_s24 + $0x88] sm:$0x3]  ;;  %v2927_v8 = vld [vmem:[%s2762_s24 + $0x98] sm:$0xff] }
  0x1b   : > { %4417 = vst [vmem:[#allocation9_spill] sm:$0xff] %v2836_v35  ;;  %v2885_v55 = vsel %vm247_vm1, %v313_v49, %v314_v50  ;;  %v2891_v57 = vld [vmem:[%s2762_s24 + $0xe8] sm:$0x3]  ;;  %v276_v60 = vrot.slane %v2888_v56, 1  ;;  %v2933_v11 = vld [vmem:[%s2762_s24 + $0xf8] sm:$0xff]  ;;  %v279_v25 = vrot.slane %v2927_v8, 1 }
  0x1c   : > { %4418 = vst [vmem:[#allocation10_spill] sm:$0xff] %v2851_v40  ;;  %v2894_v58 = vld [vmem:[%s2762_s24 + $0x148] sm:$0x3]  ;;  %v2899_v59 = vsel %vm247_vm1, %v253_v51, %v254_v52  ;;  %v296_v62 = vrot.slane %v2891_v57, 1  ;;  %v2939_v15 = vld [vmem:[%s2762_s24 + $0x158] sm:$0xff]  ;;  %v2953_v27 = vld [vmem:[%s2762_s24 + $0x30] sm:$0xff] }
  0x1d   : > { %4419 = vst [vmem:[#allocation11_spill] sm:$0xff] %v2854_v41  ;;  %2363 = vmatmul.msk.f32.gmra.mxu1 %vm330_vm2, %v2830_v33  ;;  %v2907_v61 = vld [vmem:[%s2762_s24 + $0x28] sm:$0x3]  ;;  %v316_v63 = vrot.slane %v2894_v58, 1  ;;  %v2915_v1 = vsel %vm247_vm1, %v274_v44, %v276_v60  ;;  %v2956_v29 = vld [vmem:[%s2762_s24 + $0x38] sm:$0xff]  ;;  %v298_v30 = vrot.slane %v2930_v9, 1  ;;  %v2967_v47 = vsel %vm247_vm1, %v278_v22, %v279_v25 }
  0x1e   : > { %2371 = vmatmul.msk.f32.gmra.mxu2 %vm330_vm2, %v2833_v34  ;;  %4420 = vst [vmem:[#allocation12_spill] sm:$0xff] %v2879_v53  ;;  %v256_v0 = vrot.slane %v2907_v61, 1  ;;  %v2918_v2 = vsel %vm247_vm1, %v294_v48, %v296_v62  ;;  %v299_v31 = vrot.slane %v2933_v11, 1  ;;  %v318_v32 = vrot.slane %v2936_v14, 1  ;;  %v2970_v48 = vld [vmem:[%s2762_s24 + $0xa0] sm:$0x3] }
  0x1f   : > { %2379 = vmatmul.msk.f32.gmra.mxu3 %vm330_vm2, %v2836_v35  ;;  %4421 = vst [vmem:[#allocation13_spill] sm:$0xff] %v2885_v55  ;;  %v2921_v3 = vsel %vm247_vm1, %v314_v50, %v316_v63  ;;  %v258_v43 = vrot.slane %v2953_v27, 1  ;;  %v259_v44 = vrot.slane %v2956_v29, 1  ;;  %v2979_v51 = vld [vmem:[%s2762_s24 + $0x100] sm:$0x3]  ;;  %v281_v60 = vrot.slane %v2970_v48, 1 }
  0x20   : > { %2355 = vmatmul.msk.f32.gmra.mxu0 %vm330_vm2, %v252_v42  ;;  %4422 = vst [vmem:[#allocation14_spill] sm:$0xff] %v2894_v58  ;;  %v2944_v16 = vsel %vm247_vm1, %v254_v52, %v256_v0  ;;  %v319_v42 = vrot.slane %v2939_v15, 1  ;;  %v2973_v49 = vsel %vm247_vm1, %v298_v30, %v299_v31  ;;  %v2982_v52 = vld [vmem:[%s2762_s24 + $0x160] sm:$0x3]  ;;  %v2555_v0 = vld [vmem:[%s4332_s1 + $0x18] sm:$0xf] }
  0x21   : > { %4423 = vst [vmem:[#allocation15_spill] sm:$0xff] %v2915_v1  ;;  %v2988_v62 = vsel %vm247_vm1, %v258_v43, %v259_v44  ;;  %v2991_v63 = vld [vmem:[%s2762_s24 + $0x40] sm:$0x3]  ;;  %v2589_v22 = vld [vmem:[%s4332_s1 + $0x1c] sm:$0xf]  ;;  %v321_v43 = vrot.slane %v2982_v52, 1  ;;  %2556 = vmatpush.msk.msra.mxu2 %vm395_vm0, %v2555_v0 }
  0x22   : > { %4424 = vst [vmem:[#allocation16_spill] sm:$0xff] %v2921_v3  ;;  %v2976_v50 = vsel %vm247_vm1, %v318_v32, %v319_v42  ;;  %v2521_v30 = vld [vmem:[%s4332_s1 + $0x14] sm:$0xf]  ;;  %v301_v32 = vrot.slane %v2979_v51, 1  ;;  %2590 = vmatpush.msk.msra.mxu3 %vm395_vm0, %v2589_v22  ;;  %v3024_v0 = vld [vmem:[%s2762_s24 + $0xa8] sm:$0xff] }
  0x23   : > { %4425 = vst [vmem:[#allocation17_spill] sm:$0xff] %v2936_v14  ;;  %2522 = vmatpush.msk.msra.mxu1 %vm395_vm0, %v2521_v30  ;;  %v3027_v22 = vld [vmem:[%s2762_s24 + $0xb0] sm:$0xff]  ;;  %v3030_v14 = vld [vmem:[%s2762_s24 + $0x108] sm:$0xff]  ;;  %v3083_v24 = vld [vmem:[%s2762_s24 + $0x118] sm:$0x3] }
  0x24   : > { %4426 = vst [vmem:[#allocation18_spill] sm:$0xff] %v2939_v15  ;;  %v261_v15 = vrot.slane %v2991_v63, 1  ;;  %v3018_v58 = vsel %vm247_vm1, %v299_v31, %v301_v32  ;;  %v3033_v30 = vld [vmem:[%s2762_s24 + $0x110] sm:$0xff]  ;;  %v283_v31 = vrot.slane %v3024_v0, 1 }
  0x25   : > { %2364 = vmatmul.msk.f32.gmra.mxu1 %vm330_vm2, %v2879_v53  ;;  %4427 = vst [vmem:[#allocation19_spill] sm:$0xff] %v2967_v47  ;;  %v3039_v41 = vld [vmem:[%s2762_s24 + $0x170] sm:$0xff] }
  0x26   : > { %2372 = vmatmul.msk.f32.gmra.mxu2 %vm330_vm2, %v2882_v54  ;;  %4428 = vst [vmem:[#allocation20_spill] sm:$0xff] %v2976_v50  ;;  %v3056_v32 = vld [vmem:[%s2762_s24 + $0x50] sm:$0xff] }
  0x27   : > { %2380 = vmatmul.msk.f32.gmra.mxu3 %vm330_vm2, %v2885_v55  ;;  %4429 = vst [vmem:[#allocation21_spill] sm:$0xff] %v2979_v51  ;;  %v324_v55 = vrot.slane %v3039_v41, 1  ;;  %v264_v40 = vrot.slane %v3056_v32, 1 }
  0x28   : > { %2356 = vmatmul.msk.f32.gmra.mxu0 %vm330_vm2, %v2899_v59  ;;  %4430 = vst [vmem:[#allocation22_spill] sm:$0xff] %v2982_v52  ;;  %v3021_v52 = vsel %vm247_vm1, %v319_v42, %v321_v43  ;;  %v284_v42 = vrot.slane %v3027_v22, 1  ;;  %v304_v43 = vrot.slane %v3033_v30, 1 }
  0x29   : > { %4432 = vst [vmem:[#allocation24_spill] sm:$0xff] %v3021_v52 }
  0x2a   : > { %4433 = vst [vmem:[#allocation25_spill] sm:$0xff] %v3033_v30  ;;  %v3071_v35 = vsel %vm247_vm1, %v283_v31, %v284_v42  ;;  %v3099_v31 = vld [vmem:[%s2762_s24 + $0x58] sm:$0x3] }
  0x2b   : > { %4435 = vst [vmem:[#allocation27_spill] sm:$0xff] %v3039_v41  ;;  %v3080_v41 = vld [vmem:[%s2762_s24 + $0xb8] sm:$0x3] }
  0x2c   : > { %4436 = vst [vmem:[#allocation28_spill] sm:$0xff] %v3071_v35 }
  0x2d   : > { %2365 = vmatmul.msk.f32.gmra.mxu1 %vm330_vm2, %v2915_v1  ;;  %4439 = vst [vmem:[#allocation31_spill] sm:$0xff] %v3083_v24 }
  0x2e   : > { %2373 = vmatmul.msk.f32.gmra.mxu2 %vm330_vm2, %v2918_v2 }
  0x2f   : > { %2381 = vmatmul.msk.f32.gmra.mxu3 %vm330_vm2, %v2921_v3  ;;  %v3036_v3 = vld [vmem:[%s2762_s24 + $0x168] sm:$0xff] }
  0x30   : > { %2357 = vmatmul.msk.f32.gmra.mxu0 %vm330_vm2, %v2944_v16  ;;  %4434 = vst [vmem:[#allocation26_spill] sm:$0xff] %v3036_v3 }
  0x35   : > { %2366 = vmatmul.msk.f32.gmra.mxu1 %vm330_vm2, %v2967_v47 }
  0x36   : > { %2374 = vmatmul.msk.f32.gmra.mxu2 %vm330_vm2, %v2973_v49 }
  0x37   : > { %2382 = vmatmul.msk.f32.gmra.mxu3 %vm330_vm2, %v2976_v50  ;;  %v3015_v50 = vsel %vm247_vm1, %v279_v25, %v281_v60  ;;  %v3044_v25 = vsel %vm247_vm1, %v259_v44, %v261_v15  ;;  %v3053_v60 = vld [vmem:[%s2762_s24 + $0x48] sm:$0xff]  ;;  %v2623_v15 = vld [vmem:[%s4332_s1 + $0x20] sm:$0xf]  ;;  %v303_v44 = vrot.slane %v3030_v14, 1 }
  0x38   : > { %2358 = vmatmul.msk.f32.gmra.mxu0 %vm330_vm2, %v2988_v62  ;;  %4431 = vst [vmem:[#allocation23_spill] sm:$0xff] %v3015_v50  ;;  %v263_v26 = vrot.slane %v3053_v60, 1 }
  0x39   : > { %2624 = vmatpush.msk.msra.mxu0 %vm395_vm0, %v2623_v15  ;;  %v3074_v13 = vsel %vm247_vm1, %v303_v44, %v304_v43  ;;  %v3086_v15 = vld [vmem:[%s2762_s24 + $0x178] sm:$0x3]  ;;  %v306_v44 = vrot.slane %v3083_v24, 1 }
  0x3a   : > { %4437 = vst [vmem:[#allocation29_spill] sm:$0xff] %v3074_v13  ;;  %v3091_v12 = vsel %vm247_vm1, %v263_v26, %v264_v40  ;;  %v326_v30 = vrot.slane %v3086_v15, 1  ;;  %v266_v26 = vrot.slane %v3099_v31, 1 }
  0x3c   : > { %v3118_v24 = vsel %vm247_vm1, %v264_v40, %v266_v26  ;;  %v696_v40 = vrot.slane %v2822_v28, 2  ;;  %v708_v26 = vrot.slane %v3053_v60, 2 }
  0x3d   : > { %2367 = vmatmul.msk.f32.gmra.mxu1 %vm330_vm2, %v3015_v50 }
  0x3e   : > { %2375 = vmatmul.msk.f32.gmra.mxu2 %vm330_vm2, %v3018_v58 }
  0x3f   : > { %2383 = vmatmul.msk.f32.gmra.mxu3 %vm330_vm2, %v3021_v52  ;;  %v323_v52 = vrot.slane %v3036_v3, 1 }
  0x40   : > { %2359 = vmatmul.msk.f32.gmra.mxu0 %vm330_vm2, %v3044_v25 }
  0x41   : > { %v3077_v3 = vsel %vm247_vm1, %v323_v52, %v324_v55  ;;  %v286_v52 = vrot.slane %v3080_v41, 1 }
  0x42   : > { %4438 = vst [vmem:[#allocation30_spill] sm:$0xff] %v3077_v3 }
  0x43   : > { %v3107_v51 = vsel %vm247_vm1, %v284_v42, %v286_v52  ;;  %v693_v42 = vrot.slane %v2792_v18, 2  ;;  %v699_v52 = vrot.slane %v2869_v46, 2 }
  0x44   : > { %4440 = vst [vmem:[#allocation32_spill] sm:$0xff] %v3107_v51 }
  0x45   : > { %2368 = vmatmul.msk.f32.gmra.mxu1 %vm330_vm2, %v3071_v35 }
  0x46   : > { %2376 = vmatmul.msk.f32.gmra.mxu2 %vm330_vm2, %v3074_v13  ;;  %v3110_v13 = vsel %vm247_vm1, %v304_v43, %v306_v44  ;;  %v694_v43 = vrot.slane %v2801_v21, 2 }
  0x47   : > { %2384 = vmatmul.msk.f32.gmra.mxu3 %vm330_vm2, %v3077_v3  ;;  %v3113_v3 = vsel %vm247_vm1, %v324_v55, %v326_v30 }
  0x48   : > { %2360 = vmatmul.msk.f32.gmra.mxu0 %vm330_vm2, %v3091_v12  ;;  %4441 = vst [vmem:[#allocation33_spill] sm:$0xff] %v3113_v3  ;;  %v695_v55 = vsel %vm692_vm3, %v693_v42, %v694_v43  ;;  %v697_v30 = vsel %vm692_vm3, %v694_v43, %v696_v40  ;;  %v709_v42 = vrot.slane %v3056_v32, 2  ;;  %v711_v43 = vrot.slane %v3099_v31, 2 }
  0x49   : > { %v713_v40 = vrot.slane %v2765_v5, 2 }
  0x4d   : > { %2369 = vmatmul.msk.f32.gmra.mxu1 %vm330_vm2, %v3107_v51 }
  0x4e   : > { %2377 = vmatmul.msk.f32.gmra.mxu2 %vm330_vm2, %v3110_v13 }
  0x4f   : > { %2385 = vmatmul.msk.f32.gmra.mxu3 %vm330_vm2, %v3113_v3 }
  0x50   : > { %2361 = vmatmul.msk.f32.gmra.mxu0 %vm330_vm2, %v3118_v24 }
  0x55   : > { %2387 = vmatmul.msk.f32.vlgmr.msrb.gmra.mxu1 %vm330_vm2, %v2792_v18  ;;  %v698_v18 = vrot.slane %v2866_v45, 2 }
  0x56   : > { %2421 = vmatmul.msk.f32.vlgmr.msrb.gmra.mxu2 %vm330_vm2, %v695_v55  ;;  %v3210_v55 = vsel %vm692_vm3, %v709_v42, %v711_v43 }
  0x57   : > { %2455 = vmatmul.msk.f32.vlgmr.msrb.gmra.mxu3 %vm330_vm2, %v2866_v45  ;;  %v3148_v28 = vsel %vm692_vm3, %v698_v18, %v699_v52 }
  0x58   : > { %2489 = vmatmul.msk.f32.vlgmr.msrb.gmra.mxu0 %vm330_vm2, %v2899_v59 }
  0x5d   : > { %2388 = vmatmul.msk.f32.gmra.mxu1 %vm330_vm2, %v2801_v21  ;;  %v701_v21 = vrot.slane %v2907_v61, 2 }
  0x5e   : > { %2422 = vmatmul.msk.f32.gmra.mxu2 %vm330_vm2, %v697_v30  ;;  %v714_v30 = vrot.slane %v2768_v6, 2 }
  0x5f   : > { %2456 = vmatmul.msk.f32.gmra.mxu3 %vm330_vm2, %v2869_v46  ;;  %v3160_v59 = vsel %vm692_vm3, %v699_v52, %v701_v21  ;;  %v716_v21 = vrot.slane %v2789_v17, 2  ;;  %v718_v17 = vrot.slane %v2839_v36, 2 }
  0x60   : > { %2490 = vmatmul.msk.f32.gmra.mxu0 %vm330_vm2, %v2944_v16  ;;  %v704_v16 = vrot.slane %v2956_v29, 2  ;;  %v3225_v18 = vsel %vm692_vm3, %v713_v40, %v714_v30 }
  0x61   : > { %4442 = vst [vmem:[#allocation34_spill] sm:$0xff] %v3225_v18 }
  0x65   : > { %2389 = vmatmul.msk.f32.gmra.mxu1 %vm330_vm2, %v2866_v45  ;;  %v703_v45 = vrot.slane %v2953_v27, 2 }
  0x66   : > { %2423 = vmatmul.msk.f32.gmra.mxu2 %vm330_vm2, %v3148_v28 }
  0x67   : > { %2457 = vmatmul.msk.f32.gmra.mxu3 %vm330_vm2, %v2953_v27  ;;  %v3173_v61 = vsel %vm692_vm3, %v703_v45, %v704_v16 }
  0x68   : > { %2491 = vmatmul.msk.f32.gmra.mxu0 %vm330_vm2, %v2988_v62 }
  0x6d   : > { %2390 = vmatmul.msk.f32.gmra.mxu1 %vm330_vm2, %v2869_v46  ;;  %v706_v46 = vrot.slane %v2991_v63, 2  ;;  %v3198_v63 = vsel %vm692_vm3, %v708_v26, %v709_v42  ;;  %v719_v42 = vrot.slane %v2842_v37, 2 }
  0x6e   : > { %2424 = vmatmul.msk.f32.gmra.mxu2 %vm330_vm2, %v3160_v59 }
  0x6f   : > { %2458 = vmatmul.msk.f32.gmra.mxu3 %vm330_vm2, %v2956_v29  ;;  %v3185_v44 = vsel %vm692_vm3, %v704_v16, %v706_v46 }
  0x70   : > { %2492 = vmatmul.msk.f32.gmra.mxu0 %vm330_vm2, %v3044_v25 }
  0x75   : > { %2391 = vmatmul.msk.f32.gmra.mxu1 %vm330_vm2, %v2953_v27 }
  0x76   : > { %2425 = vmatmul.msk.f32.gmra.mxu2 %vm330_vm2, %v3173_v61 }
  0x77   : > { %2459 = vmatmul.msk.f32.gmra.mxu3 %vm330_vm2, %v3053_v60 }
  0x78   : > { %2493 = vmatmul.msk.f32.gmra.mxu0 %vm330_vm2, %v3091_v12 }
  0x7d   : > { %2392 = vmatmul.msk.f32.gmra.mxu1 %vm330_vm2, %v2956_v29 }
  0x7e   : > { %2426 = vmatmul.msk.f32.gmra.mxu2 %vm330_vm2, %v3185_v44 }
  0x7f   : > { %2460 = vmatmul.msk.f32.gmra.mxu3 %vm330_vm2, %v3056_v32 }
  0x80   : > { %2494 = vmatmul.msk.f32.gmra.mxu0 %vm330_vm2, %v3118_v24 }
  0x85   : > { %2393 = vmatmul.msk.f32.gmra.mxu1 %vm330_vm2, %v3053_v60 }
  0x86   : > { %2427 = vmatmul.msk.f32.gmra.mxu2 %vm330_vm2, %v3198_v63 }
  0x87   : > { %2461 = vmatmul.msk.f32.gmra.mxu3 %vm330_vm2, %v2765_v5 }
  0x88   : > { %2495 = vmatmul.msk.f32.gmra.mxu0 %vm330_vm2, %v2795_v19 }
  0x8d   : > { %2394 = vmatmul.msk.f32.gmra.mxu1 %vm330_vm2, %v3056_v32 }
  0x8e   : > { %2428 = vmatmul.msk.f32.gmra.mxu2 %vm330_vm2, %v3210_v55 }
  0x8f   : > { %2462 = vmatmul.msk.f32.gmra.mxu3 %vm330_vm2, %v2768_v6 }
  0x90   : > { %2496 = vmatmul.msk.f32.gmra.mxu0 %vm330_vm2, %v2830_v33 }
  0x92   : > { %v3222_v31 = vpop.f32.mrf.mxu1 }
  0x95   : > { %2395 = vmatmul.msk.f32.gmra.mxu1 %vm330_vm2, %v2765_v5  ;;  %v3229_v52 = vpop.f32.mrf.mxu0  ;;  %v3245_v5 = vsel %vm692_vm3, %v714_v30, %v716_v21  ;;  %v3266_v30 = vsel %vm692_vm3, %v718_v17, %v719_v42 }
  0x96   : > { %2429 = vmatmul.msk.f32.gmra.mxu2 %vm330_vm2, %v3225_v18  ;;  %4444 = vst [vmem:[#allocation36_spill] sm:$0xff] %v3245_v5 }
  0x97   : > { %2463 = vmatmul.msk.f32.gmra.mxu3 %vm330_vm2, %v2839_v36  ;;  %4446 = vst [vmem:[#allocation38_spill] sm:$0xff] %v3266_v30 }
  0x98   : > { %2497 = vmatmul.msk.f32.gmra.mxu0 %vm330_vm2, %v2879_v53 }
  0x99   : > { %v3238_v45 = vpop.f32.mrf.mxu2 }
  0x9a   : > { %v3240_v16 = vpop.f32.mrf.mxu3  ;;  %v3242_v46 = vpop.f32.mrf.mxu1 }
  0x9b   : > { %4443 = vst [vmem:[#allocation35_spill] sm:$0xff] %v3240_v16  ;;  %v721_v16 = vrot.slane %v2888_v56, 2  ;;  %v723_v56 = vrot.slane %v2924_v4, 2 }
  0x9d   : > { %2396 = vmatmul.msk.f32.gmra.mxu1 %vm330_vm2, %v2768_v6  ;;  %v3249_v26 = vpop.f32.mrf.mxu0 }
  0x9e   : > { %2430 = vmatmul.msk.f32.gmra.mxu2 %vm330_vm2, %v3245_v5 }
  0x9f   : > { %2464 = vmatmul.msk.f32.gmra.mxu3 %vm330_vm2, %v2842_v37 }
  0xa0   : > { %2498 = vmatmul.msk.f32.gmra.mxu0 %vm330_vm2, %v2915_v1 }
  0xa1   : > { %v3259_v43 = vpop.f32.mrf.mxu2 }
  0xa2   : > { %v3261_v40 = vpop.f32.mrf.mxu3  ;;  %v3263_v6 = vpop.f32.mrf.mxu1 }
  0xa3   : > { %4445 = vst [vmem:[#allocation37_spill] sm:$0xff] %v3261_v40 }
  0xa5   : > { %2397 = vmatmul.msk.f32.gmra.mxu1 %vm330_vm2, %v2839_v36  ;;  %v3270_v21 = vpop.f32.mrf.mxu0  ;;  %v3286_v36 = vsel %vm692_vm3, %v719_v42, %v721_v16 }
  0xa6   : > { %2431 = vmatmul.msk.f32.gmra.mxu2 %vm330_vm2, %v3266_v30  ;;  %4448 = vst [vmem:[#allocation40_spill] sm:$0xff] %v3286_v36 }
  0xa7   : > { %2465 = vmatmul.msk.f32.gmra.mxu3 %vm330_vm2, %v2924_v4 }
  0xa8   : > { %2499 = vmatmul.msk.f32.gmra.mxu0 %vm330_vm2, %v2967_v47 }
  0xa9   : > { %v3279_v40 = vpop.f32.mrf.mxu2 }
  0xaa   : > { %v3281_v17 = vpop.f32.mrf.mxu3  ;;  %v3283_v1 = vpop.f32.mrf.mxu1 }
  0xab   : > { %4447 = vst [vmem:[#allocation39_spill] sm:$0xff] %v3281_v17  ;;  %v724_v17 = vrot.slane %v2927_v8, 2 }
  0xad   : > { %2398 = vmatmul.msk.f32.gmra.mxu1 %vm330_vm2, %v2842_v37  ;;  %v3290_v30 = vpop.f32.mrf.mxu0  ;;  %v3307_v47 = vsel %vm692_vm3, %v723_v56, %v724_v17 }
  0xae   : > { %2432 = vmatmul.msk.f32.gmra.mxu2 %vm330_vm2, %v3286_v36  ;;  %4450 = vst [vmem:[#allocation42_spill] sm:$0xff] %v3307_v47 }
  0xaf   : > { %2466 = vmatmul.msk.f32.gmra.mxu3 %vm330_vm2, %v2927_v8 }
  0xb0   : > { %2500 = vmatmul.msk.f32.gmra.mxu0 %vm330_vm2, %v3015_v50  ;;  %v726_v50 = vrot.slane %v2970_v48, 2  ;;  %v728_v48 = vrot.slane %v3024_v0, 2 }
  0xb1   : > { %v3300_v16 = vpop.f32.mrf.mxu2 }
  0xb2   : > { %v3302_v42 = vpop.f32.mrf.mxu3  ;;  %v3304_v37 = vpop.f32.mrf.mxu1 }
  0xb3   : > { %4449 = vst [vmem:[#allocation41_spill] sm:$0xff] %v3302_v42 }
  0xb5   : > { %2399 = vmatmul.msk.f32.gmra.mxu1 %vm330_vm2, %v2924_v4  ;;  %v3311_v36 = vpop.f32.mrf.mxu0  ;;  %v3327_v4 = vsel %vm692_vm3, %v724_v17, %v726_v50 }
  0xb6   : > { %2433 = vmatmul.msk.f32.gmra.mxu2 %vm330_vm2, %v3307_v47  ;;  %4452 = vst [vmem:[#allocation44_spill] sm:$0xff] %v3327_v4 }
  0xb7   : > { %2467 = vmatmul.msk.f32.gmra.mxu3 %vm330_vm2, %v3024_v0 }
  0xb8   : > { %2501 = vmatmul.msk.f32.gmra.mxu0 %vm330_vm2, %v3071_v35 }
  0xb9   : > { %v3320_v42 = vpop.f32.mrf.mxu2 }
  0xba   : > { %v3322_v56 = vpop.f32.mrf.mxu3  ;;  %v3324_v53 = vpop.f32.mrf.mxu1 }
  0xbb   : > { %4451 = vst [vmem:[#allocation43_spill] sm:$0xff] %v3322_v56  ;;  %v729_v56 = vrot.slane %v3027_v22, 2 }
  0xbd   : > { %2400 = vmatmul.msk.f32.gmra.mxu1 %vm330_vm2, %v2927_v8  ;;  %v3331_v47 = vpop.f32.mrf.mxu0  ;;  %v3348_v35 = vsel %vm692_vm3, %v728_v48, %v729_v56 }
  0xbe   : > { %2434 = vmatmul.msk.f32.gmra.mxu2 %vm330_vm2, %v3327_v4  ;;  %4455 = vst [vmem:[#allocation47_spill] sm:$0xff] %v3348_v35 }
  0xbf   : > { %2468 = vmatmul.msk.f32.gmra.mxu3 %vm330_vm2, %v3027_v22 }
  0xc0   : > { %2502 = vmatmul.msk.f32.gmra.mxu0 %vm330_vm2, %v3107_v51  ;;  %v731_v51 = vrot.slane %v3080_v41, 2  ;;  %v733_v41 = vrot.slane %v2771_v7, 2 }
  0xc1   : > { %v3341_v50 = vpop.f32.mrf.mxu2 }
  0xc2   : > { %4453 = vst [vmem:[#allocation45_spill] sm:$0xff] %v3341_v50  ;;  %v3343_v17 = vpop.f32.mrf.mxu3  ;;  %v3345_v8 = vpop.f32.mrf.mxu1 }
  0xc3   : > { %4454 = vst [vmem:[#allocation46_spill] sm:$0xff] %v3343_v17 }
  0xc5   : > { %2401 = vmatmul.msk.f32.gmra.mxu1 %vm330_vm2, %v3024_v0  ;;  %v3352_v4 = vpop.f32.mrf.mxu0  ;;  %v3368_v0 = vsel %vm692_vm3, %v729_v56, %v731_v51 }
  0xc6   : > { %2435 = vmatmul.msk.f32.gmra.mxu2 %vm330_vm2, %v3348_v35  ;;  %4458 = vst [vmem:[#allocation50_spill] sm:$0xff] %v3368_v0 }
  0xc7   : > { %2469 = vmatmul.msk.f32.gmra.mxu3 %vm330_vm2, %v2771_v7 }
  0xc8   : > { %2503 = vmatmul.msk.f32.gmra.mxu0 %vm330_vm2, %v2807_v23 }
  0xc9   : > { %v3361_v17 = vpop.f32.mrf.mxu2 }
  0xca   : > { %4456 = vst [vmem:[#allocation48_spill] sm:$0xff] %v3361_v17  ;;  %v3363_v48 = vpop.f32.mrf.mxu3  ;;  %v3365_v5 = vpop.f32.mrf.mxu1 }
  0xcb   : > { %4457 = vst [vmem:[#allocation49_spill] sm:$0xff] %v3363_v48  ;;  %v734_v48 = vrot.slane %v2776_v10, 2 }
  0xcd   : > { %2402 = vmatmul.msk.f32.gmra.mxu1 %vm330_vm2, %v3027_v22  ;;  %v3372_v35 = vpop.f32.mrf.mxu0  ;;  %v3387_v23 = vsel %vm692_vm3, %v733_v41, %v734_v48 }
  0xce   : > { %2436 = vmatmul.msk.f32.gmra.mxu2 %vm330_vm2, %v3368_v0  ;;  %4461 = vst [vmem:[#allocation53_spill] sm:$0xff] %v3387_v23 }
  0xcf   : > { %2470 = vmatmul.msk.f32.gmra.mxu3 %vm330_vm2, %v2776_v10 }
  0xd0   : > { %2504 = vmatmul.msk.f32.gmra.mxu0 %vm330_vm2, %v2833_v34  ;;  %v736_v34 = vrot.slane %v2798_v20, 2  ;;  %v738_v20 = vrot.slane %v2845_v38, 2 }
  0xd1   : > { %v3382_v51 = vpop.f32.mrf.mxu2 }
  0xd2   : > { %4459 = vst [vmem:[#allocation51_spill] sm:$0xff] %v3382_v51  ;;  %v3384_v56 = vpop.f32.mrf.mxu3  ;;  %v596_v22 = vpop.f32.mrf.mxu1 }
  0xd3   : > { %4460 = vst [vmem:[#allocation52_spill] sm:$0xff] %v3384_v56  ;;  %v597_v51 = vadd.f32 %v596_v22, %v3229_v52  ;;  %v739_v52 = vrot.slane %v2848_v39, 2 }
  0xd5   : > { %2403 = vmatmul.msk.f32.gmra.mxu1 %vm330_vm2, %v2771_v7  ;;  %v1175_v0 = vpop.f32.mrf.mxu0  ;;  %v3400_v7 = vsel %vm692_vm3, %v734_v48, %v736_v34 }
  0xd6   : > { %2437 = vmatmul.msk.f32.gmra.mxu2 %vm330_vm2, %v3387_v23 }
  0xd7   : > { %2471 = vmatmul.msk.f32.gmra.mxu3 %vm330_vm2, %v2845_v38 }
  0xd8   : > { %2505 = vmatmul.msk.f32.gmra.mxu0 %vm330_vm2, %v2882_v54 }
  0xd9   : > { %v859_v56 = vpop.f32.mrf.mxu2 }
  0xda   : > { %v1015_v41 = vpop.f32.mrf.mxu3  ;;  %v955_v17 = vadd.f32 %v859_v56, %v597_v51  ;;  %v599_v50 = vpop.f32.mrf.mxu1 }
  0xdb   : > { %v600_v34 = vadd.f32 %v599_v50, %v3249_v26  ;;  %v741_v26 = vrot.slane %v2891_v57, 2  ;;  %v743_v57 = vrot.slane %v2930_v9, 2 }
  0xdc   : > { %v1111_v33 = vadd.f32 %v1015_v41, %v955_v17 }
  0xdd   : > { %2404 = vmatmul.msk.f32.gmra.mxu1 %vm330_vm2, %v2776_v10  ;;  %v1178_v23 = vpop.f32.mrf.mxu0 }
  0xde   : > { %v3404_v18 = vadd.f32 %v1175_v0, %v1111_v33  ;;  %2438 = vmatmul.msk.f32.gmra.mxu2 %vm330_vm2, %v3400_v7  ;;  %v3416_v0 = vsel %vm692_vm3, %v738_v20, %v739_v52 }
  0xdf   : > { %2472 = vmatmul.msk.f32.gmra.mxu3 %vm330_vm2, %v2848_v39 }
  0xe0   : > { %2506 = vmatmul.msk.f32.gmra.mxu0 %vm330_vm2, %v2918_v2 }
  0xe1   : > { %v862_v17 = vpop.f32.mrf.mxu2 }
  0xe2   : > { %v1018_v10 = vpop.f32.mrf.mxu3  ;;  %v956_v48 = vadd.f32 %v862_v17, %v600_v34  ;;  %v602_v33 = vpop.f32.mrf.mxu1 }
  0xe3   : > { %v603_v50 = vadd.f32 %v602_v33, %v3270_v21  ;;  %v744_v21 = vrot.slane %v2933_v11, 2 }
  0xe4   : > { %v1112_v51 = vadd.f32 %v1018_v10, %v956_v48 }
  0xe5   : > { %2405 = vmatmul.msk.f32.gmra.mxu1 %vm330_vm2, %v2845_v38  ;;  %v1181_v56 = vpop.f32.mrf.mxu0 }
  0xe6   : > { %v3420_v22 = vadd.f32 %v1178_v23, %v1112_v51  ;;  %2439 = vmatmul.msk.f32.gmra.mxu2 %vm330_vm2, %v3416_v0  ;;  %v3431_v23 = vsel %vm692_vm3, %v739_v52, %v741_v26  ;;  %v3447_v26 = vsel %vm692_vm3, %v743_v57, %v744_v21 }
  0xe7   : > { %2473 = vmatmul.msk.f32.gmra.mxu3 %vm330_vm2, %v2930_v9 }
  0xe8   : > { %2507 = vmatmul.msk.f32.gmra.mxu0 %vm330_vm2, %v2973_v49 }
  0xe9   : > { %v865_v41 = vpop.f32.mrf.mxu2 }
  0xea   : > { %v1021_v20 = vpop.f32.mrf.mxu3  ;;  %v957_v34 = vadd.f32 %v865_v41, %v603_v50  ;;  %v605_v38 = vpop.f32.mrf.mxu1 }
  0xeb   : > { %v606_v52 = vadd.f32 %v605_v38, %v3290_v30  ;;  %v4463_v30 = vld [vmem:[#allocation21_spill] sm:$0xff] }
  0xec   : > { %v1113_v17 = vadd.f32 %v1021_v20, %v957_v34  ;;  %v746_v34 = vrot.slane %v4463_v30, 2 }
  0xed   : > { %2406 = vmatmul.msk.f32.gmra.mxu1 %vm330_vm2, %v2848_v39  ;;  %v1184_v10 = vpop.f32.mrf.mxu0 }
  0xee   : > { %v3435_v48 = vadd.f32 %v1181_v56, %v1113_v17  ;;  %2440 = vmatmul.msk.f32.gmra.mxu2 %vm330_vm2, %v3431_v23  ;;  %v4464_v17 = vld [vmem:[#allocation29_spill] sm:$0xff] }
  0xef   : > { %2474 = vmatmul.msk.f32.gmra.mxu3 %vm330_vm2, %v2933_v11 }
  0xf0   : > { %2508 = vmatmul.msk.f32.gmra.mxu0 %vm330_vm2, %v3018_v58 }
  0xf1   : > { %v868_v33 = vpop.f32.mrf.mxu2 }
  0xf2   : > { %v1024_v39 = vpop.f32.mrf.mxu3  ;;  %v958_v51 = vadd.f32 %v868_v33, %v606_v52  ;;  %v608_v56 = vpop.f32.mrf.mxu1 }
  0xf3   : > { %v609_v38 = vadd.f32 %v608_v56, %v3311_v36  ;;  %v4466_v36 = vld [vmem:[#allocation25_spill] sm:$0xff]  ;;  %v748_v56 = vrot.slane %v3030_v14, 2 }
  0xf4   : > { %v1114_v50 = vadd.f32 %v1024_v39, %v958_v51  ;;  %v749_v30 = vrot.slane %v4466_v36, 2 }
  0xf5   : > { %2407 = vmatmul.msk.f32.gmra.mxu1 %vm330_vm2, %v2930_v9  ;;  %v1187_v41 = vpop.f32.mrf.mxu0 }
  0xf6   : > { %v3451_v20 = vadd.f32 %v1184_v10, %v1114_v50  ;;  %2441 = vmatmul.msk.f32.gmra.mxu2 %vm330_vm2, %v3447_v26  ;;  %v3462_v10 = vsel %vm692_vm3, %v744_v21, %v746_v34 }
  0xf7   : > { %2475 = vmatmul.msk.f32.gmra.mxu3 %vm330_vm2, %v3030_v14 }
  0xf8   : > { %4462 = vst [vmem:[#allocation54_spill] sm:$0xff] %v3451_v20  ;;  %2509 = vmatmul.msk.f32.gmra.mxu0 %vm330_vm2, %v4464_v17 }
  0xf9   : > { %v871_v57 = vpop.f32.mrf.mxu2 }
  0xfa   : > { %v1027_v52 = vpop.f32.mrf.mxu3  ;;  %v959_v33 = vadd.f32 %v871_v57, %v609_v38  ;;  %v611_v9 = vpop.f32.mrf.mxu1  ;;  %v3478_v57 = vsel %vm692_vm3, %v748_v56, %v749_v30 }
  0xfb   : > { %v612_v21 = vadd.f32 %v611_v9, %v3331_v47  ;;  %v4468_v47 = vld [vmem:[#allocation2_spill] sm:$0xff]  ;;  %v4469_v9 = vld [vmem:[#allocation31_spill] sm:$0xff] }
  0xfc   : > { %v1115_v39 = vadd.f32 %v1027_v52, %v959_v33 }
  0xfd   : > { %2408 = vmatmul.msk.f32.gmra.mxu1 %vm330_vm2, %v2933_v11  ;;  %v1190_v51 = vpop.f32.mrf.mxu0 }
  0xfe   : > { %v3466_v50 = vadd.f32 %v1187_v41, %v1115_v39  ;;  %2442 = vmatmul.msk.f32.gmra.mxu2 %vm330_vm2, %v3462_v10 }
  0xff   : > { %2476 = vmatmul.msk.f32.gmra.mxu3 %vm330_vm2, %v4466_v36 }
 0x100   : > { %4465 = vst [vmem:[#allocation21_spill] sm:$0xff] %v3466_v50  ;;  %2510 = vmatmul.msk.f32.gmra.mxu0 %vm330_vm2, %v3110_v13  ;;  %v751_v50 = vrot.slane %v4469_v9, 2 }
 0x101   : > { %v874_v34 = vpop.f32.mrf.mxu2 }
 0x102   : > { %v1030_v11 = vpop.f32.mrf.mxu3  ;;  %v960_v38 = vadd.f32 %v874_v34, %v612_v21  ;;  %v614_v41 = vpop.f32.mrf.mxu1  ;;  %v4470_v34 = vld [vmem:[#allocation5_spill] sm:$0xff] }
 0x103   : > { %v615_v21 = vadd.f32 %v614_v41, %v3352_v4  ;;  %v4472_v4 = vld [vmem:[#allocation3_spill] sm:$0xff]  ;;  %v753_v41 = vrot.slane %v4468_v47, 2 }
 0x104   : > { %v1116_v52 = vadd.f32 %v1030_v11, %v960_v38  ;;  %v754_v9 = vrot.slane %v4472_v4, 2 }
 0x105   : > { %2409 = vmatmul.msk.f32.gmra.mxu1 %vm330_vm2, %v3030_v14  ;;  %v1193_v33 = vpop.f32.mrf.mxu0 }
 0x106   : > { %v3482_v39 = vadd.f32 %v1190_v51, %v1116_v52  ;;  %2443 = vmatmul.msk.f32.gmra.mxu2 %vm330_vm2, %v3478_v57  ;;  %v3493_v51 = vsel %vm692_vm3, %v749_v30, %v751_v50  ;;  %v4473_v30 = vld [vmem:[#allocation9_spill] sm:$0xff] }
 0x107   : > { %2477 = vmatmul.msk.f32.gmra.mxu3 %vm330_vm2, %v4468_v47 }
 0x108   : > { %4467 = vst [vmem:[#allocation29_spill] sm:$0xff] %v3482_v39  ;;  %2511 = vmatmul.msk.f32.gmra.mxu0 %vm330_vm2, %v4470_v34 }
 0x109   : > { %v877_v56 = vpop.f32.mrf.mxu2 }
 0x10a   : > { %v1033_v11 = vpop.f32.mrf.mxu3  ;;  %v961_v38 = vadd.f32 %v877_v56, %v615_v21  ;;  %v617_v14 = vpop.f32.mrf.mxu1 }
 0x10b   : > { %v618_v50 = vadd.f32 %v617_v14, %v3372_v35  ;;  %v4476_v35 = vld [vmem:[#allocation10_spill] sm:$0xff] }
 0x10c   : > { %v1117_v52 = vadd.f32 %v1033_v11, %v961_v38  ;;  %v3509_v11 = vsel %vm692_vm3, %v753_v41, %v754_v9  ;;  %v4477_v14 = vld [vmem:[#allocation6_spill] sm:$0xff] }
 0x10d   : > { %2410 = vmatmul.msk.f32.gmra.mxu1 %vm330_vm2, %v4466_v36  ;;  %v1196_v39 = vpop.f32.mrf.mxu0  ;;  %4474 = vst [vmem:[#allocation2_spill] sm:$0xff] %v3509_v11 }
 0x10e   : > { %v3497_v20 = vadd.f32 %v1193_v33, %v1117_v52  ;;  %2444 = vmatmul.msk.f32.gmra.mxu2 %vm330_vm2, %v3493_v51 }
 0x10f   : > { %2478 = vmatmul.msk.f32.gmra.mxu3 %vm330_vm2, %v4472_v4 }
 0x110   : > { %4471 = vst [vmem:[#allocation25_spill] sm:$0xff] %v3497_v20  ;;  %2512 = vmatmul.msk.f32.gmra.mxu0 %vm330_vm2, %v4473_v30  ;;  %v756_v30 = vrot.slane %v4477_v14, 2 }
 0x111   : > { %v880_v21 = vpop.f32.mrf.mxu2 }
 0x112   : > { %v1036_v36 = vpop.f32.mrf.mxu3  ;;  %v962_v56 = vadd.f32 %v880_v21, %v618_v50  ;;  %v620_v33 = vpop.f32.mrf.mxu1  ;;  %v4478_v21 = vld [vmem:[#allocation13_spill] sm:$0xff] }
 0x113   : > { %v621_v50 = vadd.f32 %v620_v33, %v3222_v31  ;;  %v4480_v31 = vld [vmem:[#allocation11_spill] sm:$0xff]  ;;  %v758_v33 = vrot.slane %v4476_v35, 2 }
 0x114   : > { %v1118_v38 = vadd.f32 %v1036_v36, %v962_v56  ;;  %v759_v14 = vrot.slane %v4480_v31, 2 }
 0x115   : > { %2411 = vmatmul.msk.f32.gmra.mxu1 %vm330_vm2, %v4468_v47  ;;  %v1199_v52 = vpop.f32.mrf.mxu0 }
 0x116   : > { %v3513_v20 = vadd.f32 %v1196_v39, %v1118_v38  ;;  %2445 = vmatmul.msk.f32.gmra.mxu2 %vm330_vm2, %v3509_v11  ;;  %v3524_v39 = vsel %vm692_vm3, %v754_v9, %v756_v30  ;;  %v4481_v30 = vld [vmem:[#allocation16_spill] sm:$0xff] }
 0x117   : > { %2479 = vmatmul.msk.f32.gmra.mxu3 %vm330_vm2, %v4476_v35 }
 0x118   : > { %4475 = vst [vmem:[#allocation31_spill] sm:$0xff] %v3513_v20  ;;  %2513 = vmatmul.msk.f32.gmra.mxu0 %vm330_vm2, %v4478_v21 }
 0x119   : > { %v883_v41 = vpop.f32.mrf.mxu2 }
 0x11a   : > { %v1039_v36 = vpop.f32.mrf.mxu3  ;;  %v963_v56 = vadd.f32 %v883_v41, %v621_v50  ;;  %v623_v47 = vpop.f32.mrf.mxu1 }
 0x11b   : > { %v624_v9 = vadd.f32 %v623_v47, %v3242_v46  ;;  %v4484_v46 = vld [vmem:[#allocation17_spill] sm:$0xff]  ;;  %v4485_v47 = vld [vmem:[#allocation14_spill] sm:$0xff] }
 0x11c   : > { %v1119_v38 = vadd.f32 %v1039_v36, %v963_v56  ;;  %v3540_v36 = vsel %vm692_vm3, %v758_v33, %v759_v14 }
 0x11d   : > { %2412 = vmatmul.msk.f32.gmra.mxu1 %vm330_vm2, %v4472_v4  ;;  %v1202_v20 = vpop.f32.mrf.mxu0  ;;  %4482 = vst [vmem:[#allocation3_spill] sm:$0xff] %v3540_v36 }
 0x11e   : > { %v3528_v11 = vadd.f32 %v1199_v52, %v1119_v38  ;;  %2446 = vmatmul.msk.f32.gmra.mxu2 %vm330_vm2, %v3524_v39 }
 0x11f   : > { %2480 = vmatmul.msk.f32.gmra.mxu3 %vm330_vm2, %v4480_v31 }
 0x120   : > { %4479 = vst [vmem:[#allocation5_spill] sm:$0xff] %v3528_v11  ;;  %2514 = vmatmul.msk.f32.gmra.mxu0 %vm330_vm2, %v4481_v30  ;;  %v761_v30 = vrot.slane %v4485_v47, 2 }
 0x121   : > { %v886_v50 = vpop.f32.mrf.mxu2 }
 0x122   : > { %v1042_v4 = vpop.f32.mrf.mxu3  ;;  %v964_v41 = vadd.f32 %v886_v50, %v624_v9  ;;  %v626_v52 = vpop.f32.mrf.mxu1  ;;  %v4486_v50 = vld [vmem:[#allocation20_spill] sm:$0xff] }
 0x123   : > { %v627_v9 = vadd.f32 %v626_v52, %v3263_v6  ;;  %v4488_v6 = vld [vmem:[#allocation18_spill] sm:$0xff]  ;;  %v763_v52 = vrot.slane %v4484_v46, 2 }
 0x124   : > { %v1120_v56 = vadd.f32 %v1042_v4, %v964_v41  ;;  %v764_v47 = vrot.slane %v4488_v6, 2 }
 0x125   : > { %2413 = vmatmul.msk.f32.gmra.mxu1 %vm330_vm2, %v4476_v35  ;;  %v1205_v38 = vpop.f32.mrf.mxu0 }
 0x126   : > { %v3544_v11 = vadd.f32 %v1202_v20, %v1120_v56  ;;  %2447 = vmatmul.msk.f32.gmra.mxu2 %vm330_vm2, %v3540_v36  ;;  %v3555_v20 = vsel %vm692_vm3, %v759_v14, %v761_v30  ;;  %v4489_v30 = vld [vmem:[#allocation24_spill] sm:$0xff] }
 0x127   : > { %2481 = vmatmul.msk.f32.gmra.mxu3 %vm330_vm2, %v4484_v46 }
 0x128   : > { %4483 = vst [vmem:[#allocation10_spill] sm:$0xff] %v3544_v11  ;;  %2515 = vmatmul.msk.f32.gmra.mxu0 %vm330_vm2, %v4486_v50 }
 0x129   : > { %v889_v33 = vpop.f32.mrf.mxu2 }
 0x12a   : > { %v1045_v4 = vpop.f32.mrf.mxu3  ;;  %v965_v41 = vadd.f32 %v889_v33, %v627_v9  ;;  %v629_v35 = vpop.f32.mrf.mxu1 }
 0x12b   : > { %v630_v14 = vadd.f32 %v629_v35, %v3283_v1  ;;  %v4492_v1 = vld [vmem:[#allocation26_spill] sm:$0xff] }
 0x12c   : > { %v1121_v56 = vadd.f32 %v1045_v4, %v965_v41  ;;  %v3571_v4 = vsel %vm692_vm3, %v763_v52, %v764_v47  ;;  %v4493_v35 = vld [vmem:[#allocation22_spill] sm:$0xff] }
 0x12d   : > { %2414 = vmatmul.msk.f32.gmra.mxu1 %vm330_vm2, %v4480_v31  ;;  %v1208_v11 = vpop.f32.mrf.mxu0  ;;  %4490 = vst [vmem:[#allocation13_spill] sm:$0xff] %v3571_v4  ;;  %v4494_v52 = vld [vmem:[#allocation30_spill] sm:$0xff] }
 0x12e   : > { %v3559_v36 = vadd.f32 %v1205_v38, %v1121_v56  ;;  %2448 = vmatmul.msk.f32.gmra.mxu2 %vm330_vm2, %v3555_v20 }
 0x12f   : > { %2482 = vmatmul.msk.f32.gmra.mxu3 %vm330_vm2, %v4488_v6 }
 0x130   : > { %4487 = vst [vmem:[#allocation6_spill] sm:$0xff] %v3559_v36  ;;  %2516 = vmatmul.msk.f32.gmra.mxu0 %vm330_vm2, %v4489_v30 }
 0x131   : > { %v892_v9 = vpop.f32.mrf.mxu2 }
 0x132   : > { %v1048_v31 = vpop.f32.mrf.mxu3  ;;  %v966_v33 = vadd.f32 %v892_v9, %v630_v14  ;;  %v632_v38 = vpop.f32.mrf.mxu1  ;;  %v766_v14 = vrot.slane %v4493_v35, 2  ;;  %v768_v35 = vrot.slane %v4492_v1, 2 }
 0x133   : > { %v633_v9 = vadd.f32 %v632_v38, %v3304_v37  ;;  %v4496_v37 = vld [vmem:[#allocation27_spill] sm:$0xff] }
 0x134   : > { %v1122_v41 = vadd.f32 %v1048_v31, %v966_v33  ;;  %v3597_v38 = vld [vmem:[%s2762_s24 + $0x188] sm:$0xff] }
 0x135   : > { %2415 = vmatmul.msk.f32.gmra.mxu1 %vm330_vm2, %v4484_v46  ;;  %v1211_v56 = vpop.f32.mrf.mxu0 }
 0x136   : > { %v3575_v36 = vadd.f32 %v1208_v11, %v1122_v41  ;;  %2449 = vmatmul.msk.f32.gmra.mxu2 %vm330_vm2, %v3571_v4  ;;  %v3586_v41 = vsel %vm692_vm3, %v764_v47, %v766_v14  ;;  %v769_v47 = vrot.slane %v4496_v37, 2 }
 0x137   : > { %2483 = vmatmul.msk.f32.gmra.mxu3 %vm330_vm2, %v4492_v1 }
 0x138   : > { %4491 = vst [vmem:[#allocation11_spill] sm:$0xff] %v3575_v36  ;;  %2517 = vmatmul.msk.f32.gmra.mxu0 %vm330_vm2, %v4494_v52 }
 0x139   : > { %v895_v31 = vpop.f32.mrf.mxu2 }
 0x13a   : > { %v1051_v46 = vpop.f32.mrf.mxu3  ;;  %v967_v33 = vadd.f32 %v895_v31, %v633_v9  ;;  %v635_v11 = vpop.f32.mrf.mxu1  ;;  %v3603_v9 = vld [vmem:[%s2762_s24 + $0x180] sm:$0xff]  ;;  %v1145_v31 = vrot.slane %v3597_v38, 1 }
 0x13b   : > { %v636_v14 = vadd.f32 %v635_v11, %v3324_v53  ;;  %4497 = vst [vmem:[#allocation14_spill] sm:$0xff] %v3603_v9 }
 0x13c   : > { %v1123_v36 = vadd.f32 %v1051_v46, %v967_v33 }
 0x13d   : > { %2416 = vmatmul.msk.f32.gmra.mxu1 %vm330_vm2, %v4488_v6  ;;  %v1214_v30 = vpop.f32.mrf.mxu0 }
 0x13e   : > { %v3590_v4 = vadd.f32 %v1211_v56, %v1123_v36  ;;  %2450 = vmatmul.msk.f32.gmra.mxu2 %vm330_vm2, %v3586_v41  ;;  %v1144_v56 = vrot.slane %v3603_v9, 1 }
 0x13f   : > { %2484 = vmatmul.msk.f32.gmra.mxu3 %vm330_vm2, %v4496_v37 }
 0x140   : > { %4495 = vst [vmem:[#allocation17_spill] sm:$0xff] %v3590_v4  ;;  %2518 = vmatmul.msk.f32.gmra.mxu0 %vm330_vm2, %v3113_v3  ;;  %v3610_v4 = vsel %vm692_vm3, %v768_v35, %v769_v47  ;;  %v3615_v11 = vsel %vm247_vm1, %v1144_v56, %v1145_v31  ;;  %v771_v35 = vrot.slane %v3086_v15, 2 }
 0x141   : > { %v898_v36 = vpop.f32.mrf.mxu2 }
 0x142   : > { %v1054_v6 = vpop.f32.mrf.mxu3  ;;  %v968_v46 = vadd.f32 %v898_v36, %v636_v14  ;;  %v638_v33 = vpop.f32.mrf.mxu1  ;;  %v3624_v14 = vld [vmem:[%s2762_s24 + $0x190] sm:$0x3] }
 0x143   : > { %v639_v36 = vadd.f32 %v638_v33, %v3345_v8 }
 0x144   : > { %v1124_v52 = vadd.f32 %v1054_v6, %v968_v46  ;;  %v3632_v46 = vsel %vm692_vm3, %v769_v47, %v771_v35 }
 0x145   : > { %2417 = vmatmul.msk.f32.gmra.mxu1 %vm330_vm2, %v4492_v1  ;;  %v1217_v53 = vpop.f32.mrf.mxu0 }
 0x146   : > { %v3617_v3 = vadd.f32 %v1214_v30, %v1124_v52  ;;  %2451 = vmatmul.msk.f32.gmra.mxu2 %vm330_vm2, %v3610_v4  ;;  %v1147_v30 = vrot.slane %v3624_v14, 1 }
 0x147   : > { %2485 = vmatmul.msk.f32.gmra.mxu3 %vm330_vm2, %v3603_v9 }
 0x148   : > { %4498 = vst [vmem:[#allocation20_spill] sm:$0xff] %v3617_v3  ;;  %2519 = vmatmul.msk.f32.gmra.mxu0 %vm330_vm2, %v3615_v11  ;;  %v3637_v15 = vsel %vm247_vm1, %v1145_v31, %v1147_v30 }
 0x149   : > { %v901_v1 = vpop.f32.mrf.mxu2 }
 0x14a   : > { %v1057_v6 = vpop.f32.mrf.mxu3  ;;  %v969_v52 = vadd.f32 %v901_v1, %v639_v36  ;;  %v641_v56 = vpop.f32.mrf.mxu1 }
 0x14b   : > { %v642_v33 = vadd.f32 %v641_v56, %v3365_v5 }
 0x14c   : > { %v1125_v3 = vadd.f32 %v1057_v6, %v969_v52 }
 0x14d   : > { %2418 = vmatmul.msk.f32.gmra.mxu1 %vm330_vm2, %v4496_v37  ;;  %v1220_v9 = vpop.f32.mrf.mxu0 }
 0x14e   : > { %v3639_v8 = vadd.f32 %v1217_v53, %v1125_v3  ;;  %2452 = vmatmul.msk.f32.gmra.mxu2 %vm330_vm2, %v3632_v46 }
 0x14f   : > { %2486 = vmatmul.msk.f32.gmra.mxu3 %vm330_vm2, %v3597_v38 }
 0x150   : > { %2520 = vmatmul.msk.f32.gmra.mxu0 %vm330_vm2, %v3637_v15 }
 0x151   : > { %v904_v47 = vpop.f32.mrf.mxu2 }
 0x152   : > { %v1060_v35 = vpop.f32.mrf.mxu3  ;;  %v970_v37 = vadd.f32 %v904_v47, %v642_v33  ;;  %v644_v36 = vpop.f32.mrf.mxu1 }
 0x153   : > { %v645_v5 = vadd.f32 %v644_v36, %v3238_v45 }
 0x154   : > { %v1126_v1 = vadd.f32 %v1060_v35, %v970_v37 }
 0x155   : > { %2523 = vmatmul.msk.f32.vlgmr.msra.gmra.mxu1 %vm330_vm2, %v3148_v28  ;;  %v1223_v3 = vpop.f32.mrf.mxu0 }
 0x156   : > { %v3650_v31 = vadd.f32 %v1220_v9, %v1126_v1  ;;  %2557 = vmatmul.msk.f32.vlgmr.msra.gmra.mxu2 %vm330_vm2, %v2953_v27 }
 0x157   : > { %2591 = vmatmul.msk.f32.vlgmr.msra.gmra.mxu3 %vm330_vm2, %v2988_v62 }
 0x158   : > { %2625 = vmatmul.msk.f32.vlgmr.msra.gmra.mxu0 %vm330_vm2, %v3173_v61 }
 0x159   : > { %v907_v53 = vpop.f32.mrf.mxu2 }
 0x15a   : > { %v1063_v6 = vpop.f32.mrf.mxu3  ;;  %v971_v30 = vadd.f32 %v907_v53, %v645_v5  ;;  %v647_v52 = vpop.f32.mrf.mxu1 }
 0x15b   : > { %v648_v27 = vadd.f32 %v647_v52, %v3259_v43 }
 0x15c   : > { %v1127_v56 = vadd.f32 %v1063_v6, %v971_v30 }
 0x15d   : > { %2524 = vmatmul.msk.f32.gmra.mxu1 %vm330_vm2, %v3160_v59  ;;  %v1226_v28 = vpop.f32.mrf.mxu0 }
 0x15e   : > { %v3661_v9 = vadd.f32 %v1223_v3, %v1127_v56  ;;  %2558 = vmatmul.msk.f32.gmra.mxu2 %vm330_vm2, %v2956_v29 }
 0x15f   : > { %2592 = vmatmul.msk.f32.gmra.mxu3 %vm330_vm2, %v3044_v25 }
 0x160   : > { %2626 = vmatmul.msk.f32.gmra.mxu0 %vm330_vm2, %v3185_v44 }
 0x161   : > { %v910_v62 = vpop.f32.mrf.mxu2 }
 0x162   : > { %v1066_v45 = vpop.f32.mrf.mxu3  ;;  %v972_v33 = vadd.f32 %v910_v62, %v648_v27  ;;  %v650_v47 = vpop.f32.mrf.mxu1 }
 0x163   : > { %v651_v29 = vadd.f32 %v650_v47, %v3279_v40  ;;  %v2678_v47 = vld [vmem:[%s2762_s24 + $0x68] sm:$0xff] }
 0x164   : > { %v1128_v35 = vadd.f32 %v1066_v45, %v972_v33 }
 0x165   : > { %2525 = vmatmul.msk.f32.gmra.mxu1 %vm330_vm2, %v3173_v61  ;;  %v1229_v59 = vpop.f32.mrf.mxu0 }
 0x166   : > { %v3672_v37 = vadd.f32 %v1226_v28, %v1128_v35  ;;  %2559 = vmatmul.msk.f32.gmra.mxu2 %vm330_vm2, %v3053_v60 }
 0x167   : > { %2593 = vmatmul.msk.f32.gmra.mxu3 %vm330_vm2, %v3091_v12 }
 0x168   : > { %2627 = vmatmul.msk.f32.gmra.mxu0 %vm330_vm2, %v3198_v63 }
 0x169   : > { %v913_v25 = vpop.f32.mrf.mxu2 }
 0x16a   : > { %v1069_v43 = vpop.f32.mrf.mxu3  ;;  %v973_v36 = vadd.f32 %v913_v25, %v651_v29  ;;  %v653_v1 = vpop.f32.mrf.mxu1 }
 0x16b   : > { %v654_v12 = vadd.f32 %v653_v1, %v3300_v16  ;;  %v4499_v16 = vld [vmem:[#allocation34_spill] sm:$0xff] }
 0x16c   : > { %v1129_v3 = vadd.f32 %v1069_v43, %v973_v36 }
 0x16d   : > { %2526 = vmatmul.msk.f32.gmra.mxu1 %vm330_vm2, %v3185_v44  ;;  %v1232_v61 = vpop.f32.mrf.mxu0 }
 0x16e   : > { %v3683_v5 = vadd.f32 %v1229_v59, %v1129_v3  ;;  %2560 = vmatmul.msk.f32.gmra.mxu2 %vm330_vm2, %v3056_v32  ;;  %v2677_v32 = vld [vmem:[%s2762_s24 + $0x60] sm:$0xff]  ;;  %v4502_v59 = vld [vmem:[#allocation36_spill] sm:$0xff] }
 0x16f   : > { %2594 = vmatmul.msk.f32.gmra.mxu3 %vm330_vm2, %v3118_v24 }
 0x170   : > { %2628 = vmatmul.msk.f32.gmra.mxu0 %vm330_vm2, %v3210_v55 }
 0x171   : > { %v916_v60 = vpop.f32.mrf.mxu2 }
 0x172   : > { %v1072_v40 = vpop.f32.mrf.mxu3  ;;  %v974_v53 = vadd.f32 %v916_v60, %v654_v12  ;;  %v656_v6 = vpop.f32.mrf.mxu1  ;;  %v4503_v12 = vld [vmem:[#allocation12_spill] sm:$0xff] }
 0x173   : > { %v657_v24 = vadd.f32 %v656_v6, %v3320_v42  ;;  %v4501_v42 = vld [vmem:[#allocation45_spill] sm:$0xff]  ;;  %v4504_v60 = vld [vmem:[#allocation48_spill] sm:$0xff] }
 0x174   : > { %v1130_v30 = vadd.f32 %v1072_v40, %v974_v53  ;;  %v4505_v53 = vld [vmem:[#allocation38_spill] sm:$0xff] }
 0x175   : > { %2527 = vmatmul.msk.f32.gmra.mxu1 %vm330_vm2, %v3198_v63  ;;  %v1235_v44 = vpop.f32.mrf.mxu0 }
 0x176   : > { %v3694_v52 = vadd.f32 %v1232_v61, %v1130_v30  ;;  %2561 = vmatmul.msk.f32.gmra.mxu2 %vm330_vm2, %v2677_v32  ;;  %v2679_v61 = vld [vmem:[%s2762_s24 + $0x78] sm:$0xff] }
 0x177   : > { %2595 = vmatmul.msk.f32.gmra.mxu3 %vm330_vm2, %v2795_v19  ;;  %v4500_v19 = vld [vmem:[#allocation7_spill] sm:$0xff] }
 0x178   : > { %2629 = vmatmul.msk.f32.gmra.mxu0 %vm330_vm2, %v4499_v16 }
 0x179   : > { %v919_v56 = vpop.f32.mrf.mxu2 }
 0x17a   : > { %v1075_v28 = vpop.f32.mrf.mxu3  ;;  %v975_v27 = vadd.f32 %v919_v56, %v657_v24  ;;  %v659_v62 = vpop.f32.mrf.mxu1 }
 0x17b   : > { %v660_v35 = vadd.f32 %v659_v62, %v4501_v42  ;;  %v4507_v62 = vld [vmem:[#allocation51_spill] sm:$0xff] }
 0x17c   : > { %v1131_v63 = vadd.f32 %v1075_v28, %v975_v27  ;;  %v2680_v28 = vld [vmem:[%s2762_s24 + $0x80] sm:$0xff]  ;;  %v4506_v27 = vld [vmem:[#allocation15_spill] sm:$0xff] }
 0x17d   : > { %2528 = vmatmul.msk.f32.gmra.mxu1 %vm330_vm2, %v3210_v55  ;;  %v1238_v45 = vpop.f32.mrf.mxu0 }
 0x17e   : > { %v3705_v33 = vadd.f32 %v1235_v44, %v1131_v63  ;;  %2562 = vmatmul.msk.f32.gmra.mxu2 %vm330_vm2, %v2678_v47 }
 0x17f   : > { %2596 = vmatmul.msk.f32.gmra.mxu3 %vm330_vm2, %v4500_v19 }
 0x180   : > { %2630 = vmatmul.msk.f32.gmra.mxu0 %vm330_vm2, %v4502_v59 }
 0x181   : > { %v922_v29 = vpop.f32.mrf.mxu2 }
 0x182   : > { %v1078_v25 = vpop.f32.mrf.mxu3  ;;  %v976_v43 = vadd.f32 %v922_v29, %v660_v35  ;;  %v662_v36 = vpop.f32.mrf.mxu1 }
 0x183   : > { %v663_v40 = vadd.f32 %v662_v36, %v4504_v60  ;;  %v4509_v36 = vld [vmem:[#allocation19_spill] sm:$0xff] }
 0x184   : > { %v1132_v55 = vadd.f32 %v1078_v25, %v976_v43  ;;  %v2681_v43 = vld [vmem:[%s2762_s24 + $0x90] sm:$0xff] }
 0x185   : > { %2529 = vmatmul.msk.f32.gmra.mxu1 %vm330_vm2, %v4499_v16  ;;  %v1241_v1 = vpop.f32.mrf.mxu0 }
 0x186   : > { %v3716_v3 = vadd.f32 %v1238_v45, %v1132_v55  ;;  %2563 = vmatmul.msk.f32.gmra.mxu2 %vm330_vm2, %v2679_v61  ;;  %v4508_v45 = vld [vmem:[#allocation40_spill] sm:$0xff]  ;;  %v4510_v55 = vld [vmem:[#allocation35_spill] sm:$0xff]  ;;  %v4511_v61 = vld [vmem:[#allocation42_spill] sm:$0xff] }
 0x187   : > { %2597 = vmatmul.msk.f32.gmra.mxu3 %vm330_vm2, %v4503_v12 }
 0x188   : > { %2631 = vmatmul.msk.f32.gmra.mxu0 %vm330_vm2, %v4505_v53 }
 0x189   : > { %v925_v6 = vpop.f32.mrf.mxu2 }
 0x18a   : > { %v1081_v30 = vpop.f32.mrf.mxu3  ;;  %v977_v44 = vadd.f32 %v925_v6, %v663_v40  ;;  %v665_v32 = vpop.f32.mrf.mxu1 }
 0x18b   : > { %v666_v63 = vadd.f32 %v665_v32, %v4507_v62  ;;  %v2682_v32 = vld [vmem:[%s2762_s24 + $0x98] sm:$0xff] }
 0x18c   : > { %v1133_v24 = vadd.f32 %v1081_v30, %v977_v44 }
 0x18d   : > { %2530 = vmatmul.msk.f32.gmra.mxu1 %vm330_vm2, %v4502_v59  ;;  %v1244_v16 = vpop.f32.mrf.mxu0 }
 0x18e   : > { %v3727_v56 = vadd.f32 %v1241_v1, %v1133_v24  ;;  %2564 = vmatmul.msk.f32.gmra.mxu2 %vm330_vm2, %v2680_v28  ;;  %v4512_v24 = vld [vmem:[#allocation23_spill] sm:$0xff] }
 0x18f   : > { %2598 = vmatmul.msk.f32.gmra.mxu3 %vm330_vm2, %v4506_v27  ;;  %v4514_v27 = vld [vmem:[#allocation44_spill] sm:$0xff] }
 0x190   : > { %2632 = vmatmul.msk.f32.gmra.mxu0 %vm330_vm2, %v4508_v45 }
 0x191   : > { %v928_v47 = vpop.f32.mrf.mxu2 }
 0x192   : > { %v1084_v19 = vpop.f32.mrf.mxu3  ;;  %v978_v42 = vadd.f32 %v928_v47, %v666_v63  ;;  %v668_v35 = vpop.f32.mrf.mxu1 }
 0x193   : > { %v669_v1 = vadd.f32 %v668_v35, %v4510_v55  ;;  %v4517_v55 = vld [vmem:[#allocation47_spill] sm:$0xff] }
 0x194   : > { %v1134_v59 = vadd.f32 %v1084_v19, %v978_v42 }
 0x195   : > { %2531 = vmatmul.msk.f32.gmra.mxu1 %vm330_vm2, %v4505_v53  ;;  %v1247_v29 = vpop.f32.mrf.mxu0 }
 0x196   : > { %v3738_v25 = vadd.f32 %v1244_v16, %v1134_v59  ;;  %2565 = vmatmul.msk.f32.gmra.mxu2 %vm330_vm2, %v2681_v43  ;;  %v4513_v16 = vld [vmem:[#allocation37_spill] sm:$0xff]  ;;  %v2683_v59 = vld [vmem:[%s2762_s24 + $0xa8] sm:$0xff] }
 0x197   : > { %2599 = vmatmul.msk.f32.gmra.mxu3 %vm330_vm2, %v4509_v36  ;;  %v4516_v43 = vld [vmem:[#allocation39_spill] sm:$0xff] }
 0x198   : > { %2633 = vmatmul.msk.f32.gmra.mxu0 %vm330_vm2, %v4511_v61 }
 0x199   : > { %v931_v12 = vpop.f32.mrf.mxu2 }
 0x19a   : > { %v1087_v60 = vpop.f32.mrf.mxu3  ;;  %v979_v40 = vadd.f32 %v931_v12, %v669_v1  ;;  %v671_v6 = vpop.f32.mrf.mxu1 }
 0x19b   : > { %v672_v28 = vadd.f32 %v671_v6, %v4513_v16 }
 0x19c   : > { %v1135_v53 = vadd.f32 %v1087_v60, %v979_v40 }
 0x19d   : > { %2532 = vmatmul.msk.f32.gmra.mxu1 %vm330_vm2, %v4508_v45  ;;  %v1250_v30 = vpop.f32.mrf.mxu0 }
 0x19e   : > { %v3749_v44 = vadd.f32 %v1247_v29, %v1135_v53  ;;  %2566 = vmatmul.msk.f32.gmra.mxu2 %vm330_vm2, %v2682_v32  ;;  %v4515_v29 = vld [vmem:[#allocation28_spill] sm:$0xff] }
 0x19f   : > { %2600 = vmatmul.msk.f32.gmra.mxu3 %vm330_vm2, %v4512_v24  ;;  %v4518_v32 = vld [vmem:[#allocation32_spill] sm:$0xff]  ;;  %v4519_v24 = vld [vmem:[#allocation41_spill] sm:$0xff] }
 0x1a0   : > { %2634 = vmatmul.msk.f32.gmra.mxu0 %vm330_vm2, %v4514_v27 }
 0x1a1   : > { %v934_v62 = vpop.f32.mrf.mxu2 }
 0x1a2   : > { %v1090_v63 = vpop.f32.mrf.mxu3  ;;  %v980_v47 = vadd.f32 %v934_v62, %v672_v28  ;;  %v674_v19 = vpop.f32.mrf.mxu1  ;;  %v4520_v28 = vld [vmem:[#allocation50_spill] sm:$0xff] }
 0x1a3   : > { %v675_v36 = vadd.f32 %v674_v19, %v4516_v43  ;;  %v4522_v43 = vld [vmem:[#allocation43_spill] sm:$0xff] }
 0x1a4   : > { %v1136_v45 = vadd.f32 %v1090_v63, %v980_v47 }
 0x1a5   : > { %2533 = vmatmul.msk.f32.gmra.mxu1 %vm330_vm2, %v4511_v61  ;;  %v1253_v42 = vpop.f32.mrf.mxu0 }
 0x1a6   : > { %v3760_v35 = vadd.f32 %v1250_v30, %v1136_v45  ;;  %2567 = vmatmul.msk.f32.gmra.mxu2 %vm330_vm2, %v2683_v59  ;;  %v2684_v30 = vld [vmem:[%s2762_s24 + $0xb0] sm:$0xff]  ;;  %v2685_v59 = vld [vmem:[%s2762_s24 + $0xc0] sm:$0xff] }
 0x1a7   : > { %2601 = vmatmul.msk.f32.gmra.mxu3 %vm330_vm2, %v4515_v29  ;;  %v4521_v29 = vld [vmem:[#allocation4_spill] sm:$0xff] }
 0x1a8   : > { %2635 = vmatmul.msk.f32.gmra.mxu0 %vm330_vm2, %v4517_v55 }
 0x1a9   : > { %v937_v1 = vpop.f32.mrf.mxu2 }
 0x1aa   : > { %v1093_v12 = vpop.f32.mrf.mxu3  ;;  %v981_v60 = vadd.f32 %v937_v1, %v675_v36  ;;  %v677_v40 = vpop.f32.mrf.mxu1  ;;  %v4523_v1 = vld [vmem:[#allocation53_spill] sm:$0xff] }
 0x1ab   : > { %v678_v16 = vadd.f32 %v677_v40, %v4519_v24  ;;  %v4524_v24 = vld [vmem:[#allocation8_spill] sm:$0xff] }
 0x1ac   : > { %v1137_v61 = vadd.f32 %v1093_v12, %v981_v60 }
 0x1ad   : > { %2534 = vmatmul.msk.f32.gmra.mxu1 %vm330_vm2, %v4514_v27  ;;  %v1256_v6 = vpop.f32.mrf.mxu0 }
 0x1ae   : > { %v3771_v53 = vadd.f32 %v1253_v42, %v1137_v61  ;;  %2568 = vmatmul.msk.f32.gmra.mxu2 %vm330_vm2, %v2684_v30 }
 0x1af   : > { %2602 = vmatmul.msk.f32.gmra.mxu3 %vm330_vm2, %v4518_v32  ;;  %v2686_v32 = vld [vmem:[%s2762_s24 + $0xc8] sm:$0xff] }
 0x1b0   : > { %2636 = vmatmul.msk.f32.gmra.mxu0 %vm330_vm2, %v4520_v28 }
 0x1b1   : > { %v940_v62 = vpop.f32.mrf.mxu2 }
 0x1b2   : > { %v1096_v63 = vpop.f32.mrf.mxu3  ;;  %v982_v47 = vadd.f32 %v940_v62, %v678_v16  ;;  %v680_v19 = vpop.f32.mrf.mxu1  ;;  %v4525_v16 = vld [vmem:[#allocation46_spill] sm:$0xff] }
 0x1b3   : > { %v681_v36 = vadd.f32 %v680_v19, %v4522_v43  ;;  %v4526_v43 = vld [vmem:[#allocation49_spill] sm:$0xff] }
 0x1b4   : > { %v1138_v27 = vadd.f32 %v1096_v63, %v982_v47 }
 0x1b5   : > { %2535 = vmatmul.msk.f32.gmra.mxu1 %vm330_vm2, %v4517_v55  ;;  %v1259_v45 = vpop.f32.mrf.mxu0 }
 0x1b6   : > { %v3782_v42 = vadd.f32 %v1256_v6, %v1138_v27  ;;  %2569 = vmatmul.msk.f32.gmra.mxu2 %vm330_vm2, %v2685_v59 }
 0x1b7   : > { %2603 = vmatmul.msk.f32.gmra.mxu3 %vm330_vm2, %v4521_v29  ;;  %v2687_v29 = vld [vmem:[%s2762_s24 + $0xd8] sm:$0xff] }
 0x1b8   : > { %2637 = vmatmul.msk.f32.gmra.mxu0 %vm330_vm2, %v4523_v1 }
 0x1b9   : > { %v943_v12 = vpop.f32.mrf.mxu2 }
 0x1ba   : > { %v1099_v60 = vpop.f32.mrf.mxu3  ;;  %v983_v40 = vadd.f32 %v943_v12, %v681_v36  ;;  %v683_v61 = vpop.f32.mrf.mxu1 }
 0x1bb   : > { %v684_v62 = vadd.f32 %v683_v61, %v4525_v16 }
 0x1bc   : > { %v1139_v55 = vadd.f32 %v1099_v60, %v983_v40 }
 0x1bd   : > { %2536 = vmatmul.msk.f32.gmra.mxu1 %vm330_vm2, %v4520_v28  ;;  %v1262_v6 = vpop.f32.mrf.mxu0 }
 0x1be   : > { %v3793_v30 = vadd.f32 %v1259_v45, %v1139_v55  ;;  %2570 = vmatmul.msk.f32.gmra.mxu2 %vm330_vm2, %v2686_v32  ;;  %v2688_v32 = vld [vmem:[%s2762_s24 + $0xe0] sm:$0xff] }
 0x1bf   : > { %2604 = vmatmul.msk.f32.gmra.mxu3 %vm330_vm2, %v4524_v24 }
 0x1c0   : > { %2638 = vmatmul.msk.f32.gmra.mxu0 %vm330_vm2, %v3400_v7 }
 0x1c1   : > { %v946_v63 = vpop.f32.mrf.mxu2 }
 0x1c2   : > { %v1102_v47 = vpop.f32.mrf.mxu3  ;;  %v984_v19 = vadd.f32 %v946_v63, %v684_v62  ;;  %v686_v27 = vpop.f32.mrf.mxu1 }
 0x1c3   : > { %v687_v36 = vadd.f32 %v686_v27, %v4526_v43 }
 0x1c4   : > { %v1140_v28 = vadd.f32 %v1102_v47, %v984_v19 }
 0x1c5   : > { %2537 = vmatmul.msk.f32.gmra.mxu1 %vm330_vm2, %v4523_v1  ;;  %v1265_v45 = vpop.f32.mrf.mxu0 }
 0x1c6   : > { %v3804_v59 = vadd.f32 %v1262_v6, %v1140_v28  ;;  %2571 = vmatmul.msk.f32.gmra.mxu2 %vm330_vm2, %v2687_v29  ;;  %v2689_v28 = vld [vmem:[%s2762_s24 + $0xf0] sm:$0xff] }
 0x1c7   : > { %2605 = vmatmul.msk.f32.gmra.mxu3 %vm330_vm2, %v2882_v54  ;;  %v4527_v54 = vld [vmem:[#allocation52_spill] sm:$0xff] }
 0x1c8   : > { %2639 = vmatmul.msk.f32.gmra.mxu0 %vm330_vm2, %v3416_v0 }
 0x1c9   : > { %v949_v12 = vpop.f32.mrf.mxu2 }
 0x1ca   : > { %v1105_v60 = vpop.f32.mrf.mxu3  ;;  %v985_v40 = vadd.f32 %v949_v12, %v687_v36  ;;  %v689_v61 = vpop.f32.mrf.mxu1 }
 0x1cb   : > { %v690_v24 = vadd.f32 %v689_v61, %v4527_v54 }
 0x1cc   : > { %v1141_v1 = vadd.f32 %v1105_v60, %v985_v40  ;;  %v2690_v40 = vld [vmem:[%s2762_s24 + $0xf8] sm:$0xff] }
 0x1cd   : > { %2538 = vmatmul.msk.f32.gmra.mxu1 %vm330_vm2, %v3400_v7  ;;  %v1268_v55 = vpop.f32.mrf.mxu0 }
 0x1ce   : > { %v3815_v6 = vadd.f32 %v1265_v45, %v1141_v1  ;;  %2572 = vmatmul.msk.f32.gmra.mxu2 %vm330_vm2, %v2688_v32 }
 0x1cf   : > { %2606 = vmatmul.msk.f32.gmra.mxu3 %vm330_vm2, %v2918_v2 }
 0x1d0   : > { %2640 = vmatmul.msk.f32.gmra.mxu0 %vm330_vm2, %v3431_v23 }
 0x1d1   : > { %v952_v16 = vpop.f32.mrf.mxu2 }
 0x1d2   : > { %v1108_v62 = vpop.f32.mrf.mxu3  ;;  %v986_v63 = vadd.f32 %v952_v16, %v690_v24  ;;  %v1334_v47 = vpop.f32.mrf.mxu1  ;;  %v2691_v24 = vld [vmem:[%s2762_s24 + $0x108] sm:$0xff] }
 0x1d3   : > { %v1430_v2 = vadd.f32 %v1334_v47, %v3404_v18 }
 0x1d4   : > { %v1142_v7 = vadd.f32 %v1108_v62, %v986_v63 }
 0x1d5   : > { %2539 = vmatmul.msk.f32.gmra.mxu1 %vm330_vm2, %v3416_v0  ;;  %v1809_v19 = vpop.f32.mrf.mxu0 }
 0x1d6   : > { %v3826_v27 = vadd.f32 %v1268_v55, %v1142_v7  ;;  %2573 = vmatmul.msk.f32.gmra.mxu2 %vm330_vm2, %v2689_v28 }
 0x1d7   : > { %2607 = vmatmul.msk.f32.gmra.mxu3 %vm330_vm2, %v2973_v49 }
 0x1d8   : > { %2641 = vmatmul.msk.f32.gmra.mxu0 %vm330_vm2, %v3447_v26 }
 0x1d9   : > { %v1490_v45 = vpop.f32.mrf.mxu2 }
 0x1da   : > { %v1650_v29 = vpop.f32.mrf.mxu3  ;;  %v1586_v43 = vadd.f32 %v1490_v45, %v1430_v2  ;;  %v1337_v36 = vpop.f32.mrf.mxu1 }
 0x1db   : > { %v1431_v49 = vadd.f32 %v1337_v36, %v3420_v22 }
 0x1dc   : > { %v1746_v0 = vadd.f32 %v1650_v29, %v1586_v43 }
 0x1dd   : > { %2540 = vmatmul.msk.f32.gmra.mxu1 %vm330_vm2, %v3431_v23  ;;  %v1812_v12 = vpop.f32.mrf.mxu0 }
 0x1de   : > { %v3837_v60 = vadd.f32 %v1809_v19, %v1746_v0  ;;  %2574 = vmatmul.msk.f32.gmra.mxu2 %vm330_vm2, %v2690_v40  ;;  %v2692_v19 = vld [vmem:[%s2762_s24 + $0x110] sm:$0xff]  ;;  %v2693_v0 = vld [vmem:[%s2762_s24 + $0x120] sm:$0xff] }
 0x1df   : > { %2608 = vmatmul.msk.f32.gmra.mxu3 %vm330_vm2, %v3018_v58  ;;  %v4530_v40 = vld [vmem:[#allocation2_spill] sm:$0xff] }
 0x1e0   : > { %2642 = vmatmul.msk.f32.gmra.mxu0 %vm330_vm2, %v3462_v10 }
 0x1e1   : > { %v1493_v18 = vpop.f32.mrf.mxu2 }
 0x1e2   : > { %v1653_v61 = vpop.f32.mrf.mxu3  ;;  %v1587_v1 = vadd.f32 %v1493_v18, %v1431_v49  ;;  %v1340_v55 = vpop.f32.mrf.mxu1 }
 0x1e3   : > { %v1432_v58 = vadd.f32 %v1340_v55, %v3435_v48  ;;  %v4528_v48 = vld [vmem:[#allocation54_spill] sm:$0xff] }
 0x1e4   : > { %v1747_v23 = vadd.f32 %v1653_v61, %v1587_v1 }
 0x1e5   : > { %2541 = vmatmul.msk.f32.gmra.mxu1 %vm330_vm2, %v3447_v26  ;;  %v1815_v32 = vpop.f32.mrf.mxu0 }
 0x1e6   : > { %v3848_v54 = vadd.f32 %v1812_v12, %v1747_v23  ;;  %2575 = vmatmul.msk.f32.gmra.mxu2 %vm330_vm2, %v2691_v24  ;;  %v4532_v24 = vld [vmem:[#allocation29_spill] sm:$0xff] }
 0x1e7   : > { %2609 = vmatmul.msk.f32.gmra.mxu3 %vm330_vm2, %v4464_v17 }
 0x1e8   : > { %2643 = vmatmul.msk.f32.gmra.mxu0 %vm330_vm2, %v3478_v57 }
 0x1e9   : > { %v1496_v22 = vpop.f32.mrf.mxu2 }
 0x1ea   : > { %v1656_v16 = vpop.f32.mrf.mxu3  ;;  %v1588_v62 = vadd.f32 %v1496_v22, %v1432_v58  ;;  %v1343_v63 = vpop.f32.mrf.mxu1 }
 0x1eb   : > { %v1433_v17 = vadd.f32 %v1343_v63, %v4528_v48  ;;  %v4533_v48 = vld [vmem:[#allocation25_spill] sm:$0xff] }
 0x1ec   : > { %v1748_v26 = vadd.f32 %v1656_v16, %v1588_v62 }
 0x1ed   : > { %2542 = vmatmul.msk.f32.gmra.mxu1 %vm330_vm2, %v3462_v10  ;;  %v1818_v47 = vpop.f32.mrf.mxu0 }
 0x1ee   : > { %v3859_v7 = vadd.f32 %v1815_v32, %v1748_v26  ;;  %2576 = vmatmul.msk.f32.gmra.mxu2 %vm330_vm2, %v2692_v19  ;;  %v2694_v32 = vld [vmem:[%s2762_s24 + $0x128] sm:$0xff]  ;;  %v2695_v19 = vld [vmem:[%s2762_s24 + $0x138] sm:$0xff] }
 0x1ef   : > { %2610 = vmatmul.msk.f32.gmra.mxu3 %vm330_vm2, %v3110_v13  ;;  %v4529_v13 = vld [vmem:[#allocation21_spill] sm:$0xff] }
 0x1f0   : > { %2644 = vmatmul.msk.f32.gmra.mxu0 %vm330_vm2, %v3493_v51 }
 0x1f1   : > { %v1499_v28 = vpop.f32.mrf.mxu2 }
 0x1f2   : > { %v1659_v2 = vpop.f32.mrf.mxu3  ;;  %v1589_v45 = vadd.f32 %v1499_v28, %v1433_v17  ;;  %v1346_v29 = vpop.f32.mrf.mxu1  ;;  %v4534_v28 = vld [vmem:[#allocation3_spill] sm:$0xff] }
 0x1f3   : > { %v1434_v12 = vadd.f32 %v1346_v29, %v4529_v13 }
 0x1f4   : > { %v1749_v10 = vadd.f32 %v1659_v2, %v1589_v45 }
 0x1f5   : > { %2543 = vmatmul.msk.f32.gmra.mxu1 %vm330_vm2, %v3478_v57  ;;  %v1821_v43 = vpop.f32.mrf.mxu0 }
 0x1f6   : > { %v3870_v36 = vadd.f32 %v1818_v47, %v1749_v10  ;;  %2577 = vmatmul.msk.f32.gmra.mxu2 %vm330_vm2, %v2693_v0 }
 0x1f7   : > { %2611 = vmatmul.msk.f32.gmra.mxu3 %vm330_vm2, %v4470_v34  ;;  %v4531_v34 = vld [vmem:[#allocation9_spill] sm:$0xff] }
 0x1f8   : > { %2645 = vmatmul.msk.f32.gmra.mxu0 %vm330_vm2, %v4530_v40 }
 0x1f9   : > { %v1502_v49 = vpop.f32.mrf.mxu2 }
 0x1fa   : > { %v1662_v18 = vpop.f32.mrf.mxu3  ;;  %v1590_v61 = vadd.f32 %v1502_v49, %v1434_v12  ;;  %v1349_v1 = vpop.f32.mrf.mxu1  ;;  %v2696_v12 = vld [vmem:[%s2762_s24 + $0x140] sm:$0xff] }
 0x1fb   : > { %v1435_v58 = vadd.f32 %v1349_v1, %v4532_v24 }
 0x1fc   : > { %v1750_v57 = vadd.f32 %v1662_v18, %v1590_v61 }
 0x1fd   : > { %2544 = vmatmul.msk.f32.gmra.mxu1 %vm330_vm2, %v3493_v51  ;;  %v1824_v55 = vpop.f32.mrf.mxu0 }
 0x1fe   : > { %v3881_v23 = vadd.f32 %v1821_v43, %v1750_v57  ;;  %2578 = vmatmul.msk.f32.gmra.mxu2 %vm330_vm2, %v2694_v32 }
 0x1ff   : > { %2612 = vmatmul.msk.f32.gmra.mxu3 %vm330_vm2, %v4531_v34 }
 0x200   : > { %2646 = vmatmul.msk.f32.gmra.mxu0 %vm330_vm2, %v3524_v39 }
 0x201   : > { %v1505_v22 = vpop.f32.mrf.mxu2 }
 0x202   : > { %v1665_v16 = vpop.f32.mrf.mxu3  ;;  %v1591_v62 = vadd.f32 %v1505_v22, %v1435_v58  ;;  %v1352_v63 = vpop.f32.mrf.mxu1  ;;  %v2697_v58 = vld [vmem:[%s2762_s24 + $0x150] sm:$0xff]  ;;  %v4538_v22 = vld [vmem:[#allocation13_spill] sm:$0xff] }
 0x203   : > { %v1436_v17 = vadd.f32 %v1352_v63, %v4533_v48 }
 0x204   : > { %v1751_v51 = vadd.f32 %v1665_v16, %v1591_v62 }
 0x205   : > { %2545 = vmatmul.msk.f32.gmra.mxu1 %vm330_vm2, %v4530_v40  ;;  %v1827_v26 = vpop.f32.mrf.mxu0  ;;  %v4536_v40 = vld [vmem:[#allocation31_spill] sm:$0xff] }
 0x206   : > { %v3892_v47 = vadd.f32 %v1824_v55, %v1751_v51  ;;  %2579 = vmatmul.msk.f32.gmra.mxu2 %vm330_vm2, %v2695_v19 }
 0x207   : > { %2613 = vmatmul.msk.f32.gmra.mxu3 %vm330_vm2, %v4478_v21  ;;  %v4535_v21 = vld [vmem:[#allocation16_spill] sm:$0xff] }
 0x208   : > { %2647 = vmatmul.msk.f32.gmra.mxu0 %vm330_vm2, %v4534_v28 }
 0x209   : > { %v1508_v2 = vpop.f32.mrf.mxu2 }
 0x20a   : > { %v1668_v45 = vpop.f32.mrf.mxu3  ;;  %v1592_v29 = vadd.f32 %v1508_v2, %v1436_v17  ;;  %v1355_v10 = vpop.f32.mrf.mxu1  ;;  %v2698_v2 = vld [vmem:[%s2762_s24 + $0x158] sm:$0xff] }
 0x20b   : > { %v1437_v49 = vadd.f32 %v1355_v10, %v4536_v40 }
 0x20c   : > { %v1752_v43 = vadd.f32 %v1668_v45, %v1592_v29 }
 0x20d   : > { %2546 = vmatmul.msk.f32.gmra.mxu1 %vm330_vm2, %v3524_v39  ;;  %v1830_v0 = vpop.f32.mrf.mxu0  ;;  %v4537_v39 = vld [vmem:[#allocation5_spill] sm:$0xff] }
 0x20e   : > { %v3903_v13 = vadd.f32 %v1827_v26, %v1752_v43  ;;  %2580 = vmatmul.msk.f32.gmra.mxu2 %vm330_vm2, %v2696_v12  ;;  %v4539_v26 = vld [vmem:[#allocation10_spill] sm:$0xff] }
 0x20f   : > { %2614 = vmatmul.msk.f32.gmra.mxu3 %vm330_vm2, %v4535_v21 }
 0x210   : > { %2648 = vmatmul.msk.f32.gmra.mxu0 %vm330_vm2, %v3555_v20 }
 0x211   : > { %v1511_v18 = vpop.f32.mrf.mxu2 }
 0x212   : > { %v1671_v61 = vpop.f32.mrf.mxu3  ;;  %v1593_v1 = vadd.f32 %v1511_v18, %v1437_v49  ;;  %v1358_v57 = vpop.f32.mrf.mxu1  ;;  %v2699_v49 = vld [vmem:[%s2762_s24 + $0x168] sm:$0xff]  ;;  %v4542_v18 = vld [vmem:[#allocation30_spill] sm:$0xff] }
 0x213   : > { %v1438_v55 = vadd.f32 %v1358_v57, %v4537_v39 }
 0x214   : > { %v1753_v32 = vadd.f32 %v1671_v61, %v1593_v1 }
 0x215   : > { %2547 = vmatmul.msk.f32.gmra.mxu1 %vm330_vm2, %v4534_v28  ;;  %v1833_v34 = vpop.f32.mrf.mxu0 }
 0x216   : > { %v3915_v24 = vadd.f32 %v1830_v0, %v1753_v32  ;;  %2581 = vmatmul.msk.f32.gmra.mxu2 %vm330_vm2, %v2697_v58  ;;  %v4541_v0 = vld [vmem:[#allocation6_spill] sm:$0xff] }
 0x217   : > { %2615 = vmatmul.msk.f32.gmra.mxu3 %vm330_vm2, %v4486_v50  ;;  %v4540_v50 = vld [vmem:[#allocation24_spill] sm:$0xff] }
 0x218   : > { %2649 = vmatmul.msk.f32.gmra.mxu0 %vm330_vm2, %v4538_v22 }
 0x219   : > { %v1514_v16 = vpop.f32.mrf.mxu2 }
 0x21a   : > { %v1674_v62 = vpop.f32.mrf.mxu3  ;;  %v1594_v63 = vadd.f32 %v1514_v16, %v1438_v55  ;;  %v1361_v51 = vpop.f32.mrf.mxu1  ;;  %v4543_v55 = vld [vmem:[#allocation11_spill] sm:$0xff]  ;;  %v2700_v16 = vld [vmem:[%s2762_s24 + $0x170] sm:$0xff] }
 0x21b   : > { %v1439_v19 = vadd.f32 %v1361_v51, %v4539_v26  ;;  %v1304_v26 = vrot.slane %v3597_v38, 2 }
 0x21c   : > { %v1754_v48 = vadd.f32 %v1674_v62, %v1594_v63  ;;  %v4544_v62 = vld [vmem:[#allocation33_spill] sm:$0xff]  ;;  %v4545_v63 = vld [vmem:[#allocation14_spill] sm:$0xff] }
 0x21d   : > { %2548 = vmatmul.msk.f32.gmra.mxu1 %vm330_vm2, %v3555_v20  ;;  %v1836_v17 = vpop.f32.mrf.mxu0  ;;  %v1303_v51 = vrot.slane %v4545_v63, 2 }
 0x21e   : > { %v3926_v28 = vadd.f32 %v1833_v34, %v1754_v48  ;;  %2582 = vmatmul.msk.f32.gmra.mxu2 %vm330_vm2, %v2698_v2  ;;  %v4546_v2 = vld [vmem:[#allocation17_spill] sm:$0xff] }
 0x21f   : > { %2616 = vmatmul.msk.f32.gmra.mxu3 %vm330_vm2, %v4540_v50 }
 0x220   : > { %2650 = vmatmul.msk.f32.gmra.mxu0 %vm330_vm2, %v3586_v41 }
 0x221   : > { %v1517_v45 = vpop.f32.mrf.mxu2 }
 0x222   : > { %v1677_v29 = vpop.f32.mrf.mxu3  ;;  %v1595_v10 = vadd.f32 %v1517_v45, %v1439_v19  ;;  %v1364_v43 = vpop.f32.mrf.mxu1 }
 0x223   : > { %v1440_v12 = vadd.f32 %v1364_v43, %v4541_v0 }
 0x224   : > { %v1755_v20 = vadd.f32 %v1677_v29, %v1595_v10  ;;  %v1305_v10 = vsel %vm692_vm3, %v1303_v51, %v1304_v26 }
 0x225   : > { %2549 = vmatmul.msk.f32.gmra.mxu1 %vm330_vm2, %v4538_v22  ;;  %v1839_v21 = vpop.f32.mrf.mxu0 }
 0x226   : > { %v3937_v40 = vadd.f32 %v1836_v17, %v1755_v20  ;;  %2583 = vmatmul.msk.f32.gmra.mxu2 %vm330_vm2, %v2699_v49  ;;  %v1306_v20 = vrot.slane %v3624_v14, 2 }
 0x227   : > { %2617 = vmatmul.msk.f32.gmra.mxu3 %vm330_vm2, %v4542_v18 }
 0x228   : > { %2651 = vmatmul.msk.f32.gmra.mxu0 %vm330_vm2, %v3610_v4 }
 0x229   : > { %v1520_v61 = vpop.f32.mrf.mxu2 }
 0x22a   : > { %v1680_v1 = vpop.f32.mrf.mxu3  ;;  %v1596_v57 = vadd.f32 %v1520_v61, %v1440_v12  ;;  %v1367_v39 = vpop.f32.mrf.mxu1 }
 0x22b   : > { %v1441_v32 = vadd.f32 %v1367_v39, %v4543_v55  ;;  %v1307_v55 = vsel %vm692_vm3, %v1304_v26, %v1306_v20 }
 0x22c   : > { %v1756_v34 = vadd.f32 %v1680_v1, %v1596_v57  ;;  %v195_v1 = vld [vmem:[%s2762_s24 + $0x198] sm:$0xff]  ;;  %v196_v57 = vld [vmem:[%s2762_s24 + $0x1a0] sm:$0xff] }
 0x22d   : > { %2550 = vmatmul.msk.f32.gmra.mxu1 %vm330_vm2, %v3586_v41  ;;  %v1842_v58 = vpop.f32.mrf.mxu0  ;;  %v1619_v14 = vrot.slane %v195_v1, 1 }
 0x22e   : > { %v3948_v22 = vadd.f32 %v1839_v21, %v1756_v34  ;;  %2584 = vmatmul.msk.f32.gmra.mxu2 %vm330_vm2, %v2700_v16  ;;  %v1778_v16 = vrot.slane %v195_v1, 2 }
 0x22f   : > { %2618 = vmatmul.msk.f32.gmra.mxu3 %vm330_vm2, %v4544_v62 }
 0x230   : > { %2652 = vmatmul.msk.f32.gmra.mxu0 %vm330_vm2, %v3632_v46 }
 0x231   : > { %v1523_v19 = vpop.f32.mrf.mxu2 }
 0x232   : > { %v1683_v48 = vpop.f32.mrf.mxu3  ;;  %v1597_v17 = vadd.f32 %v1523_v19, %v1441_v32  ;;  %v1370_v41 = vpop.f32.mrf.mxu1  ;;  %v1620_v32 = vrot.slane %v196_v57, 1 }
 0x233   : > { %v1442_v50 = vadd.f32 %v1370_v41, %v4546_v2 }
 0x234   : > { %v1757_v45 = vadd.f32 %v1683_v48, %v1597_v17  ;;  %v1621_v26 = vsel %vm247_vm1, %v1619_v14, %v1620_v32  ;;  %v197_v48 = vld [vmem:[%s2762_s24 + $0x1a8] sm:$0x3] }
 0x235   : > { %2551 = vmatmul.msk.f32.gmra.mxu1 %vm330_vm2, %v3610_v4  ;;  %v1845_v29 = vpop.f32.mrf.mxu0  ;;  %v4547_v4 = vld [vmem:[#allocation20_spill] sm:$0xff]  ;;  %v1622_v41 = vrot.slane %v197_v48, 1 }
 0x236   : > { %v3962_v43 = vadd.f32 %v1842_v58, %v1757_v45  ;;  %2585 = vmatmul.msk.f32.gmra.mxu2 %vm330_vm2, %v4545_v63 }
 0x237   : > { %2619 = vmatmul.msk.f32.gmra.mxu3 %vm330_vm2, %v3615_v11 }
 0x238   : > { %2653 = vmatmul.msk.f32.gmra.mxu0 %vm330_vm2, %v1305_v10 }
 0x239   : > { %v1526_v0 = vpop.f32.mrf.mxu2 }
 0x23a   : > { %v1686_v12 = vpop.f32.mrf.mxu3  ;;  %v1598_v21 = vadd.f32 %v1526_v0, %v1442_v50  ;;  %v1373_v49 = vpop.f32.mrf.mxu1  ;;  %v1781_v50 = vrot.slane %v197_v48, 2 }
 0x23b   : > { %v1443_v18 = vadd.f32 %v1373_v49, %v4547_v4 }
 0x23c   : > { %v1758_v61 = vadd.f32 %v1686_v12, %v1598_v21 }
 0x23d   : > { %2552 = vmatmul.msk.f32.gmra.mxu1 %vm330_vm2, %v3632_v46  ;;  %v1848_v39 = vpop.f32.mrf.mxu0  ;;  %v1779_v46 = vrot.slane %v196_v57, 2 }
 0x23e   : > { %v3976_v11 = vadd.f32 %v1845_v29, %v1758_v61  ;;  %2586 = vmatmul.msk.f32.gmra.mxu2 %vm330_vm2, %v3597_v38 }
 0x23f   : > { %2620 = vmatmul.msk.f32.gmra.mxu3 %vm330_vm2, %v3637_v15  ;;  %v1780_v15 = vsel %vm692_vm3, %v1778_v16, %v1779_v46  ;;  %v1782_v21 = vsel %vm692_vm3, %v1779_v46, %v1781_v50 }
 0x240   : > { %2654 = vmatmul.msk.f32.gmra.mxu0 %vm330_vm2, %v1307_v55 }
 0x241   : > { %v1529_v34 = vpop.f32.mrf.mxu2 }
 0x242   : > { %v1689_v58 = vpop.f32.mrf.mxu3  ;;  %v1599_v62 = vadd.f32 %v1529_v34, %v1443_v18  ;;  %v1376_v63 = vpop.f32.mrf.mxu1 }
 0x243   : > { %v1444_v51 = vadd.f32 %v1376_v63, %v3639_v8 }
 0x244   : > { %v1759_v19 = vadd.f32 %v1689_v58, %v1599_v62 }
 0x245   : > { %2553 = vmatmul.msk.f32.gmra.mxu1 %vm330_vm2, %v1305_v10  ;;  %v1851_v38 = vpop.f32.mrf.mxu0  ;;  %v1623_v10 = vsel %vm247_vm1, %v1620_v32, %v1622_v41 }
 0x246   : > { %v3988_v17 = vadd.f32 %v1848_v39, %v1759_v19  ;;  %2587 = vmatmul.msk.f32.gmra.mxu2 %vm330_vm2, %v195_v1 }
 0x247   : > { %2621 = vmatmul.msk.f32.gmra.mxu3 %vm330_vm2, %v1621_v26 }
 0x248   : > { %2655 = vmatmul.msk.f32.gmra.mxu0 %vm330_vm2, %v1780_v15 }
 0x249   : > { %v1532_v2 = vpop.f32.mrf.mxu2 }
 0x24a   : > { %v1692_v8 = vpop.f32.mrf.mxu3  ;;  %v1600_v45 = vadd.f32 %v1532_v2, %v1444_v51  ;;  %v1379_v29 = vpop.f32.mrf.mxu1 }
 0x24b   : > { %v1445_v0 = vadd.f32 %v1379_v29, %v3650_v31 }
 0x24c   : > { %v1760_v12 = vadd.f32 %v1692_v8, %v1600_v45 }
 0x24d   : > { %2554 = vmatmul.msk.f32.gmra.mxu1 %vm330_vm2, %v1307_v55  ;;  %v1854_v20 = vpop.f32.mrf.mxu0 }
 0x24e   : > { %v3997_v49 = vadd.f32 %v1851_v38, %v1760_v12  ;;  %2588 = vmatmul.msk.f32.gmra.mxu2 %vm330_vm2, %v196_v57 }
 0x24f   : > { %2622 = vmatmul.msk.f32.gmra.mxu3 %vm330_vm2, %v1623_v10 }
 0x250   : > { %4548 = vst [vmem:[#allocation18_spill] sm:$0xff] %v3997_v49  ;;  %2656 = vmatmul.msk.f32.gmra.mxu0 %vm330_vm2, %v1782_v21 }
 0x251   : > { %v1535_v4 = vpop.f32.mrf.mxu2 }
 0x252   : > { %v1695_v18 = vpop.f32.mrf.mxu3  ;;  %v1601_v61 = vadd.f32 %v1535_v4, %v1445_v0  ;;  %v1382_v31 = vpop.f32.mrf.mxu1 }
 0x253   : > { %v1446_v1 = vadd.f32 %v1382_v31, %v3661_v9 }
 0x254   : > { %v1761_v39 = vadd.f32 %v1695_v18, %v1601_v61 }
 0x255   : > { %v1857_v14 = vpop.f32.mrf.mxu0 }
 0x256   : > { %v4003_v55 = vadd.f32 %v1854_v20, %v1761_v39 }
 0x259   : > { %v1538_v32 = vpop.f32.mrf.mxu2 }
 0x25a   : > { %v1698_v34 = vpop.f32.mrf.mxu3  ;;  %v1602_v58 = vadd.f32 %v1538_v32, %v1446_v1  ;;  %v1385_v16 = vpop.f32.mrf.mxu1 }
 0x25b   : > { %v1447_v57 = vadd.f32 %v1385_v16, %v3672_v37 }
 0x25c   : > { %v1762_v46 = vadd.f32 %v1698_v34, %v1602_v58 }
 0x25d   : > { %v1860_v62 = vpop.f32.mrf.mxu0 }
 0x25e   : > { %v4006_v63 = vadd.f32 %v1857_v14, %v1762_v46 }
 0x261   : > { %v1541_v51 = vpop.f32.mrf.mxu2 }
 0x262   : > { %v1701_v26 = vpop.f32.mrf.mxu3  ;;  %v1603_v19 = vadd.f32 %v1541_v51, %v1447_v57  ;;  %v1388_v48 = vpop.f32.mrf.mxu1 }
 0x263   : > { %v1448_v9 = vadd.f32 %v1388_v48, %v3683_v5 }
 0x264   : > { %v1763_v38 = vadd.f32 %v1701_v26, %v1603_v19 }
 0x265   : > { %v1863_v15 = vpop.f32.mrf.mxu0 }
 0x266   : > { %v4009_v41 = vadd.f32 %v1860_v62, %v1763_v38  ;;  %v1937_v62 = vadd.f32 %v3848_v54, %v3837_v60 }
 0x269   : > { %v1544_v2 = vpop.f32.mrf.mxu2 }
 0x26a   : > { %v1704_v8 = vpop.f32.mrf.mxu3  ;;  %v1604_v50 = vadd.f32 %v1544_v2, %v1448_v9  ;;  %v1391_v45 = vpop.f32.mrf.mxu1 }
 0x26b   : > { %v1449_v37 = vadd.f32 %v1391_v45, %v3694_v52 }
 0x26c   : > { %v1764_v29 = vadd.f32 %v1704_v8, %v1604_v50 }
 0x26d   : > { %v1866_v0 = vpop.f32.mrf.mxu0 }
 0x26e   : > { %v4012_v10 = vadd.f32 %v1863_v15, %v1764_v29 }
 0x271   : > { %v1547_v12 = vpop.f32.mrf.mxu2 }
 0x272   : > { %v1707_v20 = vpop.f32.mrf.mxu3  ;;  %v1605_v21 = vadd.f32 %v1547_v12, %v1449_v37  ;;  %v1394_v4 = vpop.f32.mrf.mxu1 }
 0x273   : > { %v1450_v5 = vadd.f32 %v1394_v4, %v3705_v33  ;;  %v1938_v33 = vadd.f32 %v1937_v62, %v3859_v7 }
 0x274   : > { %v1765_v18 = vadd.f32 %v1707_v20, %v1605_v21 }
 0x275   : > { %v1869_v61 = vpop.f32.mrf.mxu0  ;;  %v1939_v26 = vadd.f32 %v1938_v33, %v3870_v36 }
 0x276   : > { %v4015_v31 = vadd.f32 %v1866_v0, %v1765_v18 }
 0x277   : > { %v1940_v19 = vadd.f32 %v1939_v26, %v3881_v23 }
 0x279   : > { %v1550_v1 = vpop.f32.mrf.mxu2  ;;  %v1941_v15 = vadd.f32 %v1940_v19, %v3892_v47 }
 0x27a   : > { %v1710_v39 = vpop.f32.mrf.mxu3  ;;  %v1606_v14 = vadd.f32 %v1550_v1, %v1450_v5  ;;  %v1397_v32 = vpop.f32.mrf.mxu1 }
 0x27b   : > { %v1942_v2 = vadd.f32 %v1941_v15, %v3903_v13  ;;  %v1451_v62 = vadd.f32 %v1397_v32, %v3716_v3 }
 0x27c   : > { %v1766_v34 = vadd.f32 %v1710_v39, %v1606_v14 }
 0x27d   : > { %v1872_v52 = vpop.f32.mrf.mxu0  ;;  %v1943_v50 = vadd.f32 %v1942_v2, %v3915_v24 }
 0x27e   : > { %v4017_v58 = vadd.f32 %v1869_v61, %v1766_v34 }
 0x27f   : > { %v1944_v45 = vadd.f32 %v1943_v50, %v3926_v28 }
 0x281   : > { %v1553_v16 = vpop.f32.mrf.mxu2  ;;  %v1945_v12 = vadd.f32 %v1944_v45, %v3937_v40 }
 0x282   : > { %v1713_v57 = vpop.f32.mrf.mxu3  ;;  %v1400_v46 = vpop.f32.mrf.mxu1  ;;  %v1607_v26 = vadd.f32 %v1553_v16, %v1451_v62 }
 0x283   : > { %v1946_v20 = vadd.f32 %v1945_v12, %v3948_v22  ;;  %v1452_v19 = vadd.f32 %v1400_v46, %v3727_v56 }
 0x285   : > { %v1875_v51 = vpop.f32.mrf.mxu0  ;;  %v1947_v4 = vadd.f32 %v1946_v20, %v3962_v43 }
 0x287   : > { %v1948_v5 = vadd.f32 %v1947_v4, %v3976_v11 }
 0x289   : > { %v1556_v48 = vpop.f32.mrf.mxu2  ;;  %v1949_v39 = vadd.f32 %v1948_v5, %v3988_v17  ;;  %v1767_v5 = vadd.f32 %v1713_v57, %v1607_v26 }
 0x28a   : > { %v1716_v9 = vpop.f32.mrf.mxu3  ;;  %v1403_v38 = vpop.f32.mrf.mxu1  ;;  %v1608_v45 = vadd.f32 %v1556_v48, %v1452_v19 }
 0x28b   : > { %v1950_v14 = vadd.f32 %v1949_v39, %v3997_v49  ;;  %v1453_v12 = vadd.f32 %v1403_v38, %v3738_v25  ;;  %v4044_v62 = vadd.f32 %v1872_v52, %v1767_v5 }
 0x28c   : > { %v1768_v16 = vadd.f32 %v1716_v9, %v1608_v45 }
 0x28d   : > { %v1878_v8 = vpop.f32.mrf.mxu0  ;;  %v1951_v33 = vadd.f32 %v1950_v14, %v4003_v55 }
 0x28f   : > { %v1952_v15 = vadd.f32 %v1951_v33, %v4006_v63 }
 0x291   : > { %v1559_v37 = vpop.f32.mrf.mxu2  ;;  %v1953_v4 = vadd.f32 %v1952_v15, %v4009_v41 }
 0x292   : > { %v1719_v29 = vpop.f32.mrf.mxu3  ;;  %v1406_v0 = vpop.f32.mrf.mxu1  ;;  %v1609_v39 = vadd.f32 %v1559_v37, %v1453_v12 }
 0x293   : > { %v1454_v49 = vadd.f32 %v1406_v0, %v3749_v44  ;;  %v1954_v3 = vadd.f32 %v1953_v4, %v4012_v10  ;;  %v4048_v44 = vadd.f32 %v1875_v51, %v1768_v16 }
 0x294   : > { %v1769_v48 = vadd.f32 %v1719_v29, %v1609_v39 }
 0x295   : > { %v1881_v21 = vpop.f32.mrf.mxu0  ;;  %v1955_v46 = vadd.f32 %v1954_v3, %v4015_v31 }
 0x297   : > { %v1956_v37 = vadd.f32 %v1955_v46, %v4017_v58 }
 0x299   : > { %v1562_v18 = vpop.f32.mrf.mxu2 }
 0x29a   : > { %v1722_v61 = vpop.f32.mrf.mxu3  ;;  %v1409_v1 = vpop.f32.mrf.mxu1  ;;  %v1610_v14 = vadd.f32 %v1562_v18, %v1454_v49  ;;  %v1957_v49 = vadd.f32 %v1956_v37, %v4044_v62 }
 0x29b   : > { %v1455_v56 = vadd.f32 %v1409_v1, %v3760_v35  ;;  %v4051_v35 = vadd.f32 %v1878_v8, %v1769_v48 }
 0x29c   : > { %v1770_v0 = vadd.f32 %v1722_v61, %v1610_v14  ;;  %v1958_v29 = vadd.f32 %v1957_v49, %v4048_v44 }
 0x29d   : > { %v1884_v34 = vpop.f32.mrf.mxu0 }
 0x29e   : > { %v4054_v1 = vadd.f32 %v1881_v21, %v1770_v0  ;;  %v1959_v19 = vadd.f32 %v1958_v29, %v4051_v35 }
 0x2a0   : > { %v1960_v45 = vadd.f32 %v1959_v19, %v4054_v1 }
 0x2a1   : > { %v1565_v2 = vpop.f32.mrf.mxu2 }
 0x2a2   : > { %v1725_v50 = vpop.f32.mrf.mxu3  ;;  %v1412_v20 = vpop.f32.mrf.mxu1  ;;  %v1611_v25 = vadd.f32 %v1565_v2, %v1455_v56 }
 0x2a3   : > { %v1456_v38 = vadd.f32 %v1412_v20, %v3771_v53 }
 0x2a4   : > { %v1771_v18 = vadd.f32 %v1725_v50, %v1611_v25 }
 0x2a5   : > { %v1887_v32 = vpop.f32.mrf.mxu0 }
 0x2a6   : > { %v4057_v15 = vadd.f32 %v1884_v34, %v1771_v18 }
 0x2a8   : > { %v1961_v50 = vadd.f32 %v1960_v45, %v4057_v15 }
 0x2a9   : > { %v1568_v33 = vpop.f32.mrf.mxu2 }
 0x2aa   : > { %v1728_v57 = vpop.f32.mrf.mxu3  ;;  %v1612_v26 = vadd.f32 %v1568_v33, %v1456_v38  ;;  %v1415_v9 = vpop.f32.mrf.mxu1 }
 0x2ab   : > { %v1457_v51 = vadd.f32 %v1415_v9, %v3782_v42 }
 0x2ac   : > { %v1772_v53 = vadd.f32 %v1728_v57, %v1612_v26 }
 0x2ad   : > { %v1890_v52 = vpop.f32.mrf.mxu0 }
 0x2ae   : > { %v1931_v12 = vadd.f32 %v1887_v32, %v1772_v53 }
 0x2b0   : > { %v1962_v21 = vadd.f32 %v1961_v50, %v1931_v12 }
 0x2b1   : > { %v1571_v61 = vpop.f32.mrf.mxu2 }
 0x2b2   : > { %v1731_v2 = vpop.f32.mrf.mxu3  ;;  %v1613_v8 = vadd.f32 %v1571_v61, %v1457_v51  ;;  %v1418_v20 = vpop.f32.mrf.mxu1 }
 0x2b3   : > { %v1458_v3 = vadd.f32 %v1418_v20, %v3793_v30 }
 0x2b4   : > { %v1773_v4 = vadd.f32 %v1731_v2, %v1613_v8  ;;  %v2709_v2 = vmov 256.0  }
 0x2b5   : > { %v1893_v5 = vpop.f32.mrf.mxu0  ;;  %2673 = vrcp.f32 %v2709_v2 }
 0x2b6   : > { %v1932_v39 = vadd.f32 %v1890_v52, %v1773_v4 }
 0x2b8   : > { %v1963_v16 = vadd.f32 %v1962_v21, %v1932_v39 }
 0x2b9   : > { %v1574_v34 = vpop.f32.mrf.mxu2 }
 0x2ba   : > { %v1734_v14 = vpop.f32.mrf.mxu3  ;;  %v1614_v56 = vadd.f32 %v1574_v34, %v1458_v3  ;;  %v1421_v42 = vpop.f32.mrf.mxu1 }
 0x2bb   : > { %v1459_v32 = vadd.f32 %v1421_v42, %v3804_v59 }
 0x2bc   : > { %v1774_v46 = vadd.f32 %v1734_v14, %v1614_v56 }
 0x2bd   : > { %v1896_v25 = vpop.f32.mrf.mxu0 }
 0x2be   : > { %v1933_v48 = vadd.f32 %v1893_v5, %v1774_v46  ;;  %v2674_v5 = vpop.eup %2673 }
 0x2bf   : > { %v1975_v3 = vmul.f32 256.0, %v2674_v5  ;;  %vm1979_vm4 = vweird.f32 %v2674_v5 }
 0x2c0   : > { %v1964_v38 = vadd.f32 %v1963_v16, %v1933_v48 }
 0x2c1   : > { %v1577_v33 = vpop.f32.mrf.mxu2  ;;  %v1976_v14 = vsub.f32 1.0, %v1975_v3 }
 0x2c2   : > { %v1737_v57 = vpop.f32.mrf.mxu3  ;;  %v1615_v37 = vadd.f32 %v1577_v33, %v1459_v32  ;;  %v1424_v0 = vpop.f32.mrf.mxu1 }
 0x2c3   : > { %v1460_v49 = vadd.f32 %v1424_v0, %v3815_v6  ;;  %v1977_v46 = vmul.f32 %v2674_v5, %v1976_v14 }
 0x2c4   : > { %v1775_v26 = vadd.f32 %v1737_v57, %v1615_v37 }
 0x2c5   : > { %v1899_v18 = vpop.f32.mrf.mxu0 }
 0x2c6   : > { %v1934_v9 = vadd.f32 %v1896_v25, %v1775_v26 }
 0x2c8   : > { %v1965_v30 = vadd.f32 %v1964_v38, %v1934_v9  ;;  %v1978_v38 = vadd.f32 %v2674_v5, %v1977_v46 }
 0x2c9   : > { %v1580_v52 = vpop.f32.mrf.mxu2 }
 0x2ca   : > { %v1740_v29 = vpop.f32.mrf.mxu3  ;;  %v1616_v53 = vadd.f32 %v1580_v52, %v1460_v49  ;;  %v1427_v51 = vpop.f32.mrf.mxu1  ;;  %v4066_v33 = vsel %vm1979_vm4, %v2674_v5, %v1978_v38 }
 0x2cb   : > { %v1461_v59 = vadd.f32 %v1427_v51, %v3826_v27 }
 0x2cc   : > { %v1776_v19 = vadd.f32 %v1740_v29, %v1616_v53 }
 0x2cd   : > { %v1902_v4 = vpop.f32.mrf.mxu0 }
 0x2ce   : > { %v1935_v61 = vadd.f32 %v1899_v18, %v1776_v19 }
 0x2d0   : > { %v1966_v45 = vadd.f32 %v1965_v30, %v1935_v61 }
 0x2d1   : > { %v1583_v8 = vpop.f32.mrf.mxu2 }
 0x2d2   : > { %v1743_v20 = vpop.f32.mrf.mxu3  ;;  %v1617_v50 = vadd.f32 %v1583_v8, %v1461_v59 }
 0x2d4   : > { %v1777_v21 = vadd.f32 %v1743_v20, %v1617_v50 }
 0x2d6   : > { %v1936_v6 = vadd.f32 %v1902_v4, %v1777_v21 }
 0x2d8   : > { %v1967_v16 = vadd.f32 %v1966_v45, %v1936_v6 }
 0x2da   : > { %v1968_v34 = vrot.slane %v1967_v16, 4 }
 0x2dc   : > { %v1969_v56 = vadd.f32 %v1968_v34, %v1967_v16 }
 0x2de   : > { %v1970_v42 = vrot.slane %v1969_v56, 2 }
 0x2e0   : > { %v1971_v25 = vadd.f32 %v1970_v42, %v1969_v56  ;;  %v4549_v56 = vld [vmem:[#allocation18_spill] sm:$0xff] }
 0x2e2   : > { %v1972_v32 = vrot.slane %v1971_v25, 1 }
 0x2e4   : > { %v1973_v27 = vadd.f32 %v1972_v32, %v1971_v25 }
 0x2e6   : > { %v4069_v57 = vmul.f32 %v4066_v33, %v1973_v27 }
 0x2e8   : > { %v4072_v37 = vsub.f32 %v1931_v12, %v4069_v57  ;;  %v4075_v0 = vsub.f32 %v1932_v39, %v4069_v57  ;;  %v4078_v26 = vsub.f32 %v1933_v48, %v4069_v57  ;;  %v4081_v49 = vsub.f32 %v1934_v9, %v4069_v57 }
 0x2e9   : > { %v4084_v30 = vsub.f32 %v1935_v61, %v4069_v57  ;;  %v4087_v18 = vsub.f32 %v1936_v6, %v4069_v57  ;;  %v4091_v52 = vsub.f32 %v3837_v60, %v4069_v57  ;;  %v4095_v12 = vsub.f32 %v3848_v54, %v4069_v57 }
 0x2ea   : > { %v4099_v39 = vsub.f32 %v3859_v7, %v4069_v57  ;;  %v4107_v29 = vsub.f32 %v3870_v36, %v4069_v57  ;;  %v4111_v60 = vsub.f32 %v3881_v23, %v4069_v57  ;;  %v4117_v7 = vsub.f32 %v3892_v47, %v4069_v57 }
 0x2eb   : > { %v2014_v48 = vmul.f32 %v4091_v52, %v4091_v52  ;;  %v2015_v9 = vmul.f32 %v4095_v12, %v4095_v12  ;;  %v4123_v36 = vsub.f32 %v3903_v13, %v4069_v57  ;;  %v4129_v2 = vsub.f32 %v3915_v24, %v4069_v57 }
 0x2ec   : > { %v2016_v54 = vmul.f32 %v4099_v39, %v4099_v39  ;;  %v2017_v19 = vmul.f32 %v4107_v29, %v4107_v29  ;;  %v2018_v23 = vmul.f32 %v4111_v60, %v4111_v60  ;;  %v2019_v47 = vmul.f32 %v4117_v7, %v4117_v7 }
 0x2ed   : > { %v2046_v53 = vadd.f32 %v2015_v9, %v2014_v48  ;;  %v4135_v45 = vsub.f32 %v3926_v28, %v4069_v57  ;;  %v2020_v13 = vmul.f32 %v4123_v36, %v4123_v36  ;;  %v4141_v20 = vsub.f32 %v3937_v40, %v4069_v57 }
 0x2ee   : > { %v2021_v24 = vmul.f32 %v4129_v2, %v4129_v2  ;;  %v4147_v4 = vsub.f32 %v3948_v22, %v4069_v57  ;;  %v4153_v21 = vsub.f32 %v3962_v43, %v4069_v57  ;;  %v4159_v3 = vsub.f32 %v3976_v11, %v4069_v57 }
 0x2ef   : > { %v2047_v51 = vadd.f32 %v2046_v53, %v2016_v54  ;;  %v2022_v28 = vmul.f32 %v4135_v45, %v4135_v45  ;;  %v2023_v40 = vmul.f32 %v4141_v20, %v4141_v20  ;;  %v4165_v34 = vsub.f32 %v3988_v17, %v4069_v57 }
 0x2f0   : > { %v2024_v22 = vmul.f32 %v4147_v4, %v4147_v4  ;;  %v2025_v43 = vmul.f32 %v4153_v21, %v4153_v21  ;;  %v4171_v42 = vsub.f32 %v4549_v56, %v4069_v57  ;;  %v2026_v11 = vmul.f32 %v4159_v3, %v4159_v3 }
 0x2f1   : > { %v2048_v61 = vadd.f32 %v2047_v51, %v2017_v19  ;;  %v4177_v25 = vsub.f32 %v4003_v55, %v4069_v57  ;;  %v2027_v17 = vmul.f32 %v4165_v34, %v4165_v34  ;;  %v4183_v38 = vsub.f32 %v4006_v63, %v4069_v57 }
 0x2f2   : > { %v2028_v27 = vmul.f32 %v4171_v42, %v4171_v42  ;;  %v4189_v9 = vsub.f32 %v4009_v41, %v4069_v57  ;;  %v4195_v53 = vsub.f32 %v4012_v10, %v4069_v57  ;;  %v4201_v51 = vsub.f32 %v4015_v31, %v4069_v57 }
 0x2f3   : > { %v2049_v59 = vadd.f32 %v2048_v61, %v2018_v23  ;;  %v2029_v55 = vmul.f32 %v4177_v25, %v4177_v25  ;;  %v2030_v63 = vmul.f32 %v4183_v38, %v4183_v38  ;;  %v4207_v61 = vsub.f32 %v4017_v58, %v4069_v57 }
 0x2f4   : > { %v2031_v41 = vmul.f32 %v4189_v9, %v4189_v9  ;;  %v2032_v10 = vmul.f32 %v4195_v53, %v4195_v53  ;;  %v2033_v31 = vmul.f32 %v4201_v51, %v4201_v51  ;;  %v2040_v56 = vmul.f32 %v4072_v37, %v4072_v37 }
 0x2f5   : > { %v2050_v8 = vadd.f32 %v2049_v59, %v2019_v47  ;;  %v4213_v59 = vsub.f32 %v4044_v62, %v4069_v57  ;;  %v2034_v58 = vmul.f32 %v4207_v61, %v4207_v61 }
 0x2f7   : > { %v2051_v50 = vadd.f32 %v2050_v8, %v2020_v13  ;;  %v4219_v8 = vsub.f32 %v4048_v44, %v4069_v57  ;;  %v2035_v62 = vmul.f32 %v4213_v59, %v4213_v59 }
 0x2f9   : > { %v2052_v5 = vadd.f32 %v2051_v50, %v2021_v24  ;;  %v4225_v50 = vsub.f32 %v4051_v35, %v4069_v57  ;;  %v2036_v44 = vmul.f32 %v4219_v8, %v4219_v8 }
 0x2fb   : > { %v2053_v6 = vadd.f32 %v2052_v5, %v2022_v28  ;;  %v4231_v5 = vsub.f32 %v4054_v1, %v4069_v57  ;;  %v2037_v35 = vmul.f32 %v4225_v50, %v4225_v50 }
 0x2fd   : > { %v2054_v16 = vadd.f32 %v2053_v6, %v2023_v40  ;;  %v4237_v6 = vsub.f32 %v4057_v15, %v4069_v57  ;;  %v2041_v15 = vmul.f32 %v4075_v0, %v4075_v0 }
 0x2ff   : > { %v2055_v14 = vadd.f32 %v2054_v16, %v2024_v22  ;;  %v2038_v16 = vmul.f32 %v4231_v5, %v4231_v5  ;;  %v2039_v1 = vmul.f32 %v4237_v6, %v4237_v6 }
 0x301   : > { %v2056_v46 = vadd.f32 %v2055_v14, %v2025_v43 }
 0x303   : > { %v2057_v32 = vadd.f32 %v2056_v46, %v2026_v11  ;;  %v2042_v46 = vmul.f32 %v4078_v26, %v4078_v26 }
 0x305   : > { %v2058_v48 = vadd.f32 %v2057_v32, %v2027_v17  ;;  %v2043_v32 = vmul.f32 %v4081_v49, %v4081_v49 }
 0x307   : > { %v2059_v54 = vadd.f32 %v2058_v48, %v2028_v27  ;;  %v2044_v48 = vmul.f32 %v4084_v30, %v4084_v30 }
 0x309   : > { %v2060_v19 = vadd.f32 %v2059_v54, %v2029_v55  ;;  %v2045_v54 = vmul.f32 %v4087_v18, %v4087_v18 }
 0x30b   : > { %v2061_v23 = vadd.f32 %v2060_v19, %v2030_v63 }
 0x30d   : > { %v2062_v47 = vadd.f32 %v2061_v23, %v2031_v41 }
 0x30f   : > { %v2063_v13 = vadd.f32 %v2062_v47, %v2032_v10 }
 0x311   : > { %v2064_v24 = vadd.f32 %v2063_v13, %v2033_v31 }
 0x313   : > { %v2065_v28 = vadd.f32 %v2064_v24, %v2034_v58 }
 0x315   : > { %v2066_v40 = vadd.f32 %v2065_v28, %v2035_v62 }
 0x317   : > { %v2067_v22 = vadd.f32 %v2066_v40, %v2036_v44 }
 0x319   : > { %v2068_v43 = vadd.f32 %v2067_v22, %v2037_v35 }
 0x31b   : > { %v2069_v14 = vadd.f32 %v2068_v43, %v2038_v16 }
 0x31d   : > { %v2070_v11 = vadd.f32 %v2069_v14, %v2039_v1 }
 0x31f   : > { %v2071_v57 = vadd.f32 %v2070_v11, %v2040_v56 }
 0x321   : > { %v2072_v17 = vadd.f32 %v2071_v57, %v2041_v15 }
 0x323   : > { %v2073_v27 = vadd.f32 %v2072_v17, %v2042_v46 }
 0x325   : > { %v2074_v55 = vadd.f32 %v2073_v27, %v2043_v32 }
 0x327   : > { %v2075_v63 = vadd.f32 %v2074_v55, %v2044_v48 }
 0x329   : > { %v2076_v19 = vadd.f32 %v2075_v63, %v2045_v54 }
 0x32b   : > { %v2077_v41 = vrot.slane %v2076_v19, 4 }
 0x32d   : > { %v2078_v23 = vadd.f32 %v2077_v41, %v2076_v19 }
 0x32f   : > { %v2079_v10 = vrot.slane %v2078_v23, 2 }
 0x331   : > { %v2080_v47 = vadd.f32 %v2079_v10, %v2078_v23 }
 0x333   : > { %v2081_v31 = vrot.slane %v2080_v47, 1 }
 0x335   : > { %v2082_v13 = vadd.f32 %v2081_v31, %v2080_v47 }
 0x337   : > { %v2083_v58 = vmul.f32 %v2082_v13, %v4066_v33 }
 0x339   : > { %v2084_v24 = vadd.f32 1e-05, %v2083_v58 }
 0x33b   : > { %2675 = vrsqrt.f32 %v2084_v24  ;;  %vm2091_vm6 = vweird.f32 %v2084_v24 }
 0x341   : > { %v2676_v62 = vpop.eup %2675 }
 0x342   : > { %v2086_v28 = vmul.f32 %v2676_v62, %v2084_v24  ;;  %vm2092_vm5 = vweird.f32 %v2676_v62 }
 0x343   : > { %vm2093_vm7 = vmor %vm2091_vm6, %vm2092_vm5 }
 0x344   : > { %v2087_v44 = vmul.f32 %v2676_v62, %v2086_v28 }
 0x346   : > { %v2088_v40 = vmul.f32 0.5, %v2087_v44 }
 0x348   : > { %v2089_v35 = vsub.f32 1.5, %v2088_v40 }
 0x34a   : > { %v2090_v22 = vmul.f32 %v2676_v62, %v2089_v35 }
 0x34c   : > { %v4258_v16 = vsel %vm2093_vm7, %v2676_v62, %v2090_v22 }
 0x34d   : > { %v2111_v43 = vmul.f32 %v4258_v16, %v4183_v38  ;;  %v2095_v1 = vmul.f32 %v4258_v16, %v4091_v52  ;;  %v2112_v56 = vmul.f32 %v4258_v16, %v4189_v9  ;;  %v2096_v57 = vmul.f32 %v4258_v16, %v4095_v12 }
 0x34e   : > { %v2113_v52 = vmul.f32 %v4258_v16, %v4195_v53  ;;  %v2097_v9 = vmul.f32 %v4258_v16, %v4099_v39  ;;  %v2114_v12 = vmul.f32 %v4258_v16, %v4201_v51  ;;  %v2098_v53 = vmul.f32 %v4258_v16, %v4107_v29 }
 0x34f   : > { %vm2143_vm8 = vcmp.ge.f32.partialorder %v2111_v43, 0.0  ;;  %v2175_v33 = vmul.f32 0.01, %v2111_v43  ;;  %vm2127_vm9 = vcmp.ge.f32.partialorder %v2095_v1, 0.0  ;;  %v2159_v14 = vmul.f32 0.01, %v2095_v1 }
 0x350   : > { %v2176_v46 = vmul.f32 0.01, %v2112_v56  ;;  %vm2144_vm10 = vcmp.ge.f32.partialorder %v2112_v56, 0.0  ;;  %v2160_v38 = vmul.f32 0.01, %v2096_v57  ;;  %vm2128_vm11 = vcmp.ge.f32.partialorder %v2096_v57, 0.0 }
 0x351   : > { %v2207_v11 = vsel %vm2143_vm8, %v2111_v43, %v2175_v33  ;;  %v2191_v15 = vsel %vm2127_vm9, %v2095_v1, %v2159_v14  ;;  %v2177_v27 = vmul.f32 0.01, %v2113_v52  ;;  %vm2145_vm12 = vcmp.ge.f32.partialorder %v2113_v52, 0.0 }
 0x352   : > { %2255 = vxpose.xlu1.b32.start [1/16] (narrow) %v2207_v11, 8  ;;  %2223 = vxpose.xlu0.b32.start [1/16] (narrow) %v2191_v15, 8  ;;  %v2208_v17 = vsel %vm2144_vm10, %v2112_v56, %v2176_v46  ;;  %v2192_v32 = vsel %vm2128_vm11, %v2096_v57, %v2160_v38  ;;  %v2161_v48 = vmul.f32 0.01, %v2097_v9  ;;  %vm2129_vm13 = vcmp.ge.f32.partialorder %v2097_v9, 0.0 }
 0x353   : > { %v2209_v55 = vsel %vm2145_vm12, %v2113_v52, %v2177_v27  ;;  %v2178_v63 = vmul.f32 0.01, %v2114_v12  ;;  %vm2146_vm14 = vcmp.ge.f32.partialorder %v2114_v12, 0.0  ;;  %v2162_v19 = vmul.f32 0.01, %v2098_v53 }
 0x354   : > { %v2193_v54 = vsel %vm2129_vm13, %v2097_v9, %v2161_v48  ;;  %vm2130_vm15 = vcmp.ge.f32.partialorder %v2098_v53, 0.0  ;;  %v2115_v39 = vmul.f32 %v4258_v16, %v4207_v61  ;;  %v2099_v51 = vmul.f32 %v4258_v16, %v4111_v60 }
 0x355   : > { %v2210_v41 = vsel %vm2146_vm14, %v2114_v12, %v2178_v63  ;;  %v2194_v23 = vsel %vm2130_vm15, %v2098_v53, %v2162_v19  ;;  %v2116_v29 = vmul.f32 %v4258_v16, %v4213_v59  ;;  %v2100_v61 = vmul.f32 %v4258_v16, %v4117_v7 }
 0x356   : > { %v2179_v10 = vmul.f32 0.01, %v2115_v39  ;;  %vm2147_vm0 = vcmp.ge.f32.partialorder %v2115_v39, 0.0  ;;  %v2163_v47 = vmul.f32 0.01, %v2099_v51  ;;  %vm2131_vm1 = vcmp.ge.f32.partialorder %v2099_v51, 0.0 }
 0x357   : > { %v2180_v58 = vmul.f32 0.01, %v2116_v29  ;;  %vm2148_vm2 = vcmp.ge.f32.partialorder %v2116_v29, 0.0  ;;  %v2164_v24 = vmul.f32 0.01, %v2100_v61  ;;  %vm2132_vm3 = vcmp.ge.f32.partialorder %v2100_v61, 0.0 }
 0x358   : > { %v2211_v31 = vsel %vm2147_vm0, %v2115_v39, %v2179_v10  ;;  %v2195_v13 = vsel %vm2131_vm1, %v2099_v51, %v2163_v47  ;;  %v2117_v60 = vmul.f32 %v4258_v16, %v4219_v8  ;;  %v2101_v59 = vmul.f32 %v4258_v16, %v4123_v36 }
 0x359   : > { %v2212_v62 = vsel %vm2148_vm2, %v2116_v29, %v2180_v58  ;;  %v2196_v28 = vsel %vm2132_vm3, %v2100_v61, %v2164_v24  ;;  %v2118_v7 = vmul.f32 %v4258_v16, %v4225_v50  ;;  %v2102_v8 = vmul.f32 %v4258_v16, %v4129_v2 }
 0x35a   : > { %2256 = vxpose.xlu1.b32.cont [2/16] (narrow) %v2208_v17, 8  ;;  %2224 = vxpose.xlu0.b32.cont [2/16] (narrow) %v2192_v32, 8  ;;  %v2181_v44 = vmul.f32 0.01, %v2117_v60  ;;  %vm2149_vm4 = vcmp.ge.f32.partialorder %v2117_v60, 0.0  ;;  %vm2133_vm5 = vcmp.ge.f32.partialorder %v2101_v59, 0.0  ;;  %v2119_v36 = vmul.f32 %v4258_v16, %v4231_v5 }
 0x35b   : > { %v2165_v40 = vmul.f32 0.01, %v2101_v59  ;;  %v2182_v43 = vmul.f32 0.01, %v2118_v7  ;;  %vm2150_vm6 = vcmp.ge.f32.partialorder %v2118_v7, 0.0  ;;  %vm2134_vm7 = vcmp.ge.f32.partialorder %v2102_v8, 0.0 }
 0x35c   : > { %v2213_v35 = vsel %vm2149_vm4, %v2117_v60, %v2181_v44  ;;  %v2166_v1 = vmul.f32 0.01, %v2102_v8  ;;  %v2103_v14 = vmul.f32 %v4258_v16, %v4135_v45  ;;  %v2183_v56 = vmul.f32 0.01, %v2119_v36 }
 0x35d   : > { %v2197_v22 = vsel %vm2133_vm5, %v2101_v59, %v2165_v40  ;;  %v2214_v33 = vsel %vm2150_vm6, %v2118_v7, %v2182_v43  ;;  %vm2151_vm8 = vcmp.ge.f32.partialorder %v2119_v36, 0.0  ;;  %v2120_v2 = vmul.f32 %v4258_v16, %v4237_v6 }
 0x35e   : > { %v2198_v50 = vsel %vm2134_vm7, %v2102_v8, %v2166_v1  ;;  %v2167_v11 = vmul.f32 0.01, %v2103_v14  ;;  %vm2135_vm9 = vcmp.ge.f32.partialorder %v2103_v14, 0.0  ;;  %v2215_v15 = vsel %vm2151_vm8, %v2119_v36, %v2183_v56 }
 0x35f   : > { %v2104_v57 = vmul.f32 %v4258_v16, %v4141_v20  ;;  %v2184_v46 = vmul.f32 0.01, %v2120_v2  ;;  %vm2152_vm10 = vcmp.ge.f32.partialorder %v2120_v2, 0.0  ;;  %v2121_v38 = vmul.f32 %v4258_v16, %v4072_v37 }
 0x360   : > { %v2199_v5 = vsel %vm2135_vm9, %v2103_v14, %v2167_v11  ;;  %v2105_v17 = vmul.f32 %v4258_v16, %v4147_v4  ;;  %v2122_v9 = vmul.f32 %v4258_v16, %v4075_v0  ;;  %v2106_v48 = vmul.f32 %v4258_v16, %v4153_v21 }
 0x361   : > { %v2168_v45 = vmul.f32 0.01, %v2104_v57  ;;  %vm2136_vm11 = vcmp.ge.f32.partialorder %v2104_v57, 0.0  ;;  %v2216_v52 = vsel %vm2152_vm10, %v2120_v2, %v2184_v46  ;;  %v2185_v32 = vmul.f32 0.01, %v2121_v38 }
 0x362   : > { %2257 = vxpose.xlu1.b32.cont [3/16] (narrow) %v2209_v55, 8  ;;  %2225 = vxpose.xlu0.b32.cont [3/16] (narrow) %v2193_v54, 8  ;;  %vm2153_vm12 = vcmp.ge.f32.partialorder %v2121_v38, 0.0  ;;  %v2169_v20 = vmul.f32 0.01, %v2105_v17  ;;  %vm2137_vm13 = vcmp.ge.f32.partialorder %v2105_v17, 0.0  ;;  %v2123_v55 = vmul.f32 %v4258_v16, %v4078_v26 }
 0x363   : > { %v2200_v6 = vsel %vm2136_vm11, %v2104_v57, %v2168_v45  ;;  %v2217_v27 = vsel %vm2153_vm12, %v2121_v38, %v2185_v32  ;;  %v2186_v12 = vmul.f32 0.01, %v2122_v9  ;;  %vm2154_vm14 = vcmp.ge.f32.partialorder %v2122_v9, 0.0 }
 0x364   : > { %v2201_v37 = vsel %vm2137_vm13, %v2105_v17, %v2169_v20  ;;  %v2170_v4 = vmul.f32 0.01, %v2106_v48  ;;  %vm2138_vm15 = vcmp.ge.f32.partialorder %v2106_v48, 0.0  ;;  %v2107_v53 = vmul.f32 %v4258_v16, %v4159_v3 }
 0x365   : > { %v2218_v54 = vsel %vm2154_vm14, %v2122_v9, %v2186_v12  ;;  %v2187_v63 = vmul.f32 0.01, %v2123_v55  ;;  %vm2155_vm0 = vcmp.ge.f32.partialorder %v2123_v55, 0.0  ;;  %v2124_v19 = vmul.f32 %v4258_v16, %v4081_v49 }
 0x366   : > { %v2202_v0 = vsel %vm2138_vm15, %v2106_v48, %v2170_v4  ;;  %v2171_v21 = vmul.f32 0.01, %v2107_v53  ;;  %vm2139_vm1 = vcmp.ge.f32.partialorder %v2107_v53, 0.0  ;;  %v2125_v51 = vmul.f32 %v4258_v16, %v4084_v30 }
 0x367   : > { %v2219_v39 = vsel %vm2155_vm0, %v2123_v55, %v2187_v63  ;;  %vm2156_vm2 = vcmp.ge.f32.partialorder %v2124_v19, 0.0  ;;  %v2109_v47 = vmul.f32 %v4258_v16, %v4171_v42  ;;  %v2110_v61 = vmul.f32 %v4258_v16, %v4177_v25 }
 0x368   : > { %v2203_v26 = vsel %vm2139_vm1, %v2107_v53, %v2171_v21  ;;  %v2189_v29 = vmul.f32 0.01, %v2125_v51  ;;  %vm2157_vm4 = vcmp.ge.f32.partialorder %v2125_v51, 0.0 }
 0x369   : > { %vm2141_vm5 = vcmp.ge.f32.partialorder %v2109_v47, 0.0  ;;  %v2174_v42 = vmul.f32 0.01, %v2110_v61  ;;  %vm2142_vm7 = vcmp.ge.f32.partialorder %v2110_v61, 0.0 }
 0x36a   : > { %2258 = vxpose.xlu1.b32.cont [4/16] (narrow) %v2210_v41, 8  ;;  %2226 = vxpose.xlu0.b32.cont [4/16] (narrow) %v2194_v23, 8  ;;  %v2108_v41 = vmul.f32 %v4258_v16, %v4165_v34  ;;  %v2188_v23 = vmul.f32 0.01, %v2124_v19  ;;  %v2173_v34 = vmul.f32 0.01, %v2109_v47 }
 0x36b   : > { %v2206_v60 = vsel %vm2142_vm7, %v2110_v61, %v2174_v42 }
 0x36c   : > { %v2172_v3 = vmul.f32 0.01, %v2108_v41  ;;  %vm2140_vm3 = vcmp.ge.f32.partialorder %v2108_v41, 0.0  ;;  %v2220_v10 = vsel %vm2156_vm2, %v2124_v19, %v2188_v23  ;;  %v2205_v30 = vsel %vm2141_vm5, %v2109_v47, %v2173_v34 }
 0x36e   : > { %v2204_v49 = vsel %vm2140_vm3, %v2108_v41, %v2172_v3 }
 0x372   : > { %2259 = vxpose.xlu1.b32.cont [5/16] (narrow) %v2211_v31, 8  ;;  %2227 = vxpose.xlu0.b32.cont [5/16] (narrow) %v2195_v13, 8  ;;  %v2126_v31 = vmul.f32 %v4258_v16, %v4087_v18  ;;  %v2221_v13 = vsel %vm2157_vm4, %v2125_v51, %v2189_v29 }
 0x374   : > { %v2190_v58 = vmul.f32 0.01, %v2126_v31  ;;  %vm2158_vm6 = vcmp.ge.f32.partialorder %v2126_v31, 0.0 }
 0x376   : > { %v2222_v24 = vsel %vm2158_vm6, %v2126_v31, %v2190_v58 }
 0x37a   : > { %2260 = vxpose.xlu1.b32.cont [6/16] (narrow) %v2212_v62, 8  ;;  %2228 = vxpose.xlu0.b32.cont [6/16] (narrow) %v2196_v28, 8 }
 0x382   : > { %2261 = vxpose.xlu1.b32.cont [7/16] (narrow) %v2213_v35, 8  ;;  %2229 = vxpose.xlu0.b32.cont [7/16] (narrow) %v2197_v22, 8 }
 0x38a   : > { %2262 = vxpose.xlu1.b32.cont [8/16] (narrow) %v2214_v33, 8  ;;  %2230 = vxpose.xlu0.b32.cont [8/16] (narrow) %v2198_v50, 8 }
 0x392   : > { %2263 = vxpose.xlu1.b32.cont [9/16] (narrow) %v2215_v15, 8  ;;  %2231 = vxpose.xlu0.b32.cont [9/16] (narrow) %v2199_v5, 8 }
 0x39a   : > { %2264 = vxpose.xlu1.b32.cont [10/16] (narrow) %v2216_v52, 8  ;;  %2232 = vxpose.xlu0.b32.cont [10/16] (narrow) %v2200_v6, 8 }
 0x3a2   : > { %2265 = vxpose.xlu1.b32.cont [11/16] (narrow) %v2217_v27, 8  ;;  %2233 = vxpose.xlu0.b32.cont [11/16] (narrow) %v2201_v37, 8 }
 0x3aa   : > { %2266 = vxpose.xlu1.b32.cont [12/16] (narrow) %v2218_v54, 8  ;;  %2234 = vxpose.xlu0.b32.cont [12/16] (narrow) %v2202_v0, 8 }
 0x3b2   : > { %2267 = vxpose.xlu1.b32.cont [13/16] (narrow) %v2219_v39, 8  ;;  %2235 = vxpose.xlu0.b32.cont [13/16] (narrow) %v2203_v26, 8 }
 0x3ba   : > { %2268 = vxpose.xlu1.b32.cont [14/16] (narrow) %v2220_v10, 8  ;;  %2236 = vxpose.xlu0.b32.cont [14/16] (narrow) %v2204_v49, 8 }
 0x3c2   : > { %2269 = vxpose.xlu1.b32.cont [15/16] (narrow) %v2221_v13, 8  ;;  %2237 = vxpose.xlu0.b32.cont [15/16] (narrow) %v2205_v30, 8 }
 0x3ca   : > { %2270 = vxpose.xlu1.b32.end [16/16] (narrow) %v2222_v24, 8  ;;  %2238 = vxpose.xlu0.b32.end [16/16] (narrow) %v2206_v60, 8 }
 0x3f6   : > { %v2271_v18 = vpop.trf.xlu1  ;;  %v2239_v62 = vpop.trf.xlu0 }
 0x3f7   : > { %2288 = vst [vmem:[%s143_s8 + $0x8] sm:$0xff] %v2271_v18 }
 0x3f8   : > { %2287 = vst [vmem:[%s143_s8] sm:$0xff] %v2239_v62 }
 0x3f9 PF: > { %s12_s9 = sadd.s32 1, %s2707_s9  }
 0x3fa   : > { %p9_p4 = scmp.ge.s32.totalorder %s12_s9, 4  }
 0x3fc   :  { %11 = sbr.rel (!%p9_p4) target bundleno = 1 (0x1), region = 66 }

</bundles_post_ra>
